<compile_context>
chip_gen: v7x
topology: tpu7x:2x2x1
jax: 0.10.0
libtpu: 0.0.40
codegen_flags: <defaults>
</compile_context>

<pallas_src>
import jax
import jax.numpy as jnp
from jax.experimental import pallas as pl
from jax.experimental.pallas import tpu as pltpu

IN_FEATURES = 768
OUT_FEATURES = 1000
LANE = 128


def _default_n_tiles():
    """2 output tiles on v7x (2 TensorCores/chip); 1 elsewhere, where extra
    grid steps are pure per-step overhead."""
    try:
        kind = jax.devices()[0].device_kind.lower()
    except Exception:
        return 1
    return 2 if "v7" in kind else 1


def _plan_tiles(n_tiles):
    """Return (grid_n, block_n, padded_n) for the output/lane dimension."""
    if n_tiles <= 1:
        # Single full-dim block: no weight padding needed; only the last
        # 8x104 store group is masked.
        return 1, OUT_FEATURES, OUT_FEATURES
    per_tile = -(-OUT_FEATURES // n_tiles)
    block_n = -(-per_tile // LANE) * LANE        # lane-aligned tile width
    grid_n = -(-OUT_FEATURES // block_n)
    # Weight/bias are zero-padded to grid_n * block_n so every *input* block
    # read is fully in-bounds; only the final *output* block write is masked.
    return grid_n, block_n, grid_n * block_n


def linear_kernel(x_ref, w_ref, b_ref, o_ref):
    # Hot path: one resident MXU matmul (bf16 x bf16 -> f32) + f32 bias add.
    x_bf16 = x_ref[...].astype(jnp.bfloat16)     # 8x768 cast: a few VPU ops
    acc = jnp.dot(x_bf16, w_ref[...], preferred_element_type=jnp.float32)
    o_ref[...] = (acc + b_ref[...]).astype(o_ref.dtype)


def vicreg_head(x, w_bf16, b_f32, n_tiles=None):
    """x: [B, 768] f32; w: [768, padded_n] bf16; b: [1, padded_n] f32.

    Returns y: [B, 1000] f32 == x @ W + b (nn.Linear(768, 1000) semantics).
    """
    if n_tiles is None:
        n_tiles = _default_n_tiles()
    grid_n, block_n, padded_n = _plan_tiles(n_tiles)

    B, K = x.shape
    assert K == IN_FEATURES
    assert w_bf16.shape == (IN_FEATURES, padded_n) and w_bf16.dtype == jnp.bfloat16
    assert b_f32.shape == (1, padded_n)

    bytes_accessed = (
        x.size * x.dtype.itemsize
        + w_bf16.size * w_bf16.dtype.itemsize
        + b_f32.size * b_f32.dtype.itemsize
        + B * OUT_FEATURES * x.dtype.itemsize
    )

    return pl.pallas_call(
        linear_kernel,
        out_shape=jax.ShapeDtypeStruct((B, OUT_FEATURES), x.dtype),
        grid_spec=pl.GridSpec(
            grid=(grid_n,),
            in_specs=[
                pl.BlockSpec((B, IN_FEATURES), lambda j: (0, 0)),      # x stays resident
                pl.BlockSpec((IN_FEATURES, block_n), lambda j: (0, j)),  # weight N-tile
                pl.BlockSpec((1, block_n), lambda j: (0, j)),            # bias N-tile
            ],
            out_specs=pl.BlockSpec((B, block_n), lambda j: (0, j)),
        ),
        compiler_params=pltpu.CompilerParams(
            # Independent output tiles -> shardable across v7x's two TCs.
            dimension_semantics=("parallel",),
        ),
        cost_estimate=pl.CostEstimate(
            flops=2 * B * IN_FEATURES * OUT_FEATURES,
            transcendentals=0,
            bytes_accessed=bytes_accessed,
        ),
    )(x, w_bf16, b_f32)


def init_params(key):
    # Deterministic init mimicking nn.Linear's uniform(-1/sqrt(fan_in), 1/sqrt(fan_in)).
    kw, kb = jax.random.split(key)
    bound = 1.0 / jnp.sqrt(jnp.float32(IN_FEATURES))
    # PyTorch stores weight as [out, in]; the kernel uses the transposed layout.
    w = jax.random.uniform(kw, (IN_FEATURES, OUT_FEATURES), jnp.float32, -bound, bound)
    b = jax.random.uniform(kb, (1, OUT_FEATURES), jnp.float32, -bound, bound)
    return w, b


def prepare_params(w, b, n_tiles=None):
    """One-time weight prep: zero-pad the lane dim to the tile-plan width and
    store the weight in bf16 (halves the dominant HBM weight read)."""
    if n_tiles is None:
        n_tiles = _default_n_tiles()
    _, _, padded_n = _plan_tiles(n_tiles)
    pad = padded_n - OUT_FEATURES
    w_p = jnp.pad(w, ((0, 0), (0, pad))).astype(jnp.bfloat16)
    b_p = jnp.pad(b, ((0, 0), (0, pad))).astype(jnp.float32)
    return w_p, b_p


if __name__ == "__main__":
    key = jax.random.PRNGKey(0)
    kx, kp = jax.random.split(key)

    B = 8  # small batch; feature dims fixed by the module (768 -> 1000)
    x = jax.random.normal(kx, (B, IN_FEATURES), jnp.float32)
    w, b = init_params(kp)
    w_prep, b_prep = prepare_params(w, b)

    y = vicreg_head(x, w_prep, b_prep)
    y = jax.block_until_ready(y)

    # Tight check against a JAX reference with matching bf16 quantization.
    y_ref_bf16 = (
        jnp.dot(x.astype(jnp.bfloat16), w.astype(jnp.bfloat16),
                preferred_element_type=jnp.float32)
        + b
    )
    # Loose check against the full-precision module semantics (bf16 weight error).
    y_ref_f32 = x @ w + b

    assert y.shape == (B, OUT_FEATURES)
    assert jnp.allclose(y, y_ref_bf16, atol=2e-3, rtol=2e-3)
    assert jnp.allclose(y, y_ref_f32, atol=5e-2, rtol=5e-2)

    print("KERNEL_OK")
</pallas_src>

<mosaic_0001>
module attributes {stable_mosaic.version = 11 : i64} {
  func.func @linear_kernel(%arg0: i32, %arg1: memref<8x768xf32, #tpu.memory_space<vmem>>, %arg2: memref<768x1000xbf16, #tpu.memory_space<vmem>>, %arg3: memref<1x1000xf32, #tpu.memory_space<vmem>>, %arg4: memref<8x1000xf32, #tpu.memory_space<vmem>>) attributes {dimension_semantics = [#tpu.dimension_semantics<parallel>], iteration_bounds = array<i64: 1>, scalar_prefetch = 0 : i64, scratch_operands = 0 : i64, tpu.core_type = #tpu.core_type<tc>, window_params = [{pipeline_mode = #tpu.pipeline_mode<synchronous>, transform_indices = @transform_0, window_bounds = array<i64: 8, 768>}, {transform_indices = @transform_1, window_bounds = array<i64: 768, 1000>}, {transform_indices = @transform_2, window_bounds = array<i64: 1, 1000>}, {transform_indices = @transform_3, window_bounds = array<i64: 8, 1000>}]} {
    %c0 = arith.constant 0 : index
    %c0_0 = arith.constant 0 : index
    %0 = vector.load %arg1[%c0, %c0_0] : memref<8x768xf32, #tpu.memory_space<vmem>>, vector<8x768xf32>
    %1 = arith.truncf %0 : vector<8x768xf32> to vector<8x768xbf16>
    %c0_1 = arith.constant 0 : index
    %c0_2 = arith.constant 0 : index
    %2 = vector.load %arg2[%c0_1, %c0_2] : memref<768x1000xbf16, #tpu.memory_space<vmem>>, vector<768x1000xbf16>
    %cst = arith.constant dense<0.000000e+00> : vector<8x1000xf32>
    %3 = tpu.matmul %1, %2, %cst {dimension_numbers = #tpu.dot_dimension_numbers<[1], [0], [0], [1], [0, 0, 1, 1], [], []>} : vector<8x768xbf16>, vector<768x1000xbf16>, vector<8x1000xf32> -> vector<8x1000xf32>
    %c0_3 = arith.constant 0 : index
    %c0_4 = arith.constant 0 : index
    %4 = vector.load %arg3[%c0_3, %c0_4] : memref<1x1000xf32, #tpu.memory_space<vmem>>, vector<1x1000xf32>
    %5 = vector.broadcast %4 : vector<1x1000xf32> to vector<8x1000xf32>
    %6 = arith.addf %3, %5 : vector<8x1000xf32>
    %c0_5 = arith.constant 0 : index
    %c0_6 = arith.constant 0 : index
    %7 = vector.load %arg4[%c0_5, %c0_6] : memref<8x1000xf32, #tpu.memory_space<vmem>>, vector<8x1000xf32>
    tpu.vector_store %arg4[%c0_5, %c0_6], %6 {strides = array<i32>} : memref<8x1000xf32, #tpu.memory_space<vmem>>, vector<8x1000xf32>,
    return
  }
  func.func @transform_0(%arg0: i32) -> (i32, i32) {
    %c0_i32 = arith.constant 0 : i32
    %c0_i32_0 = arith.constant 0 : i32
    %c0_i32_1 = arith.constant 0 : i32
    return %c0_i32, %c0_i32_0 : i32, i32
  }
  func.func @transform_1(%arg0: i32) -> (i32, i32) {
    %c0_i32 = arith.constant 0 : i32
    %c0_i32_0 = arith.constant 0 : i32
    return %c0_i32, %arg0 : i32, i32
  }
  func.func @transform_2(%arg0: i32) -> (i32, i32) {
    %c0_i32 = arith.constant 0 : i32
    %c0_i32_0 = arith.constant 0 : i32
    return %c0_i32, %arg0 : i32, i32
  }
  func.func @transform_3(%arg0: i32) -> (i32, i32) {
    %c0_i32 = arith.constant 0 : i32
    %c0_i32_0 = arith.constant 0 : i32
    return %c0_i32, %arg0 : i32, i32
  }
}

</mosaic_0001>

<bundles_post_ra>
// kernel: tpu_custom_call.1
= control target key start
LH: loop header
LB: loop body
LE: loop exit
PB: predicated region body
PF: predicated region fallthrough
CT: control target
= control target key end

     0   :  { %s4579_s0 = inlined_call_operand.vmem [shape: f32[8,768], index: 0, kind: input, shape index: {}]   ;;  %s4580_s1 = inlined_call_operand.vmem [shape: bf16[768,1000], index: 1, kind: input, shape index: {}]   ;;  %s4581_s2 = inlined_call_operand.vmem [shape: f32[1,1000], index: 2, kind: input, shape index: {}]   ;;  %s4582_s3 = inlined_call_operand.hbm [shape: f32[8,1000], index: 3, kind: output, shape index: {}]  }
   0x1   :  { %v27_v0 = vld [vmem:[%s4580_s1] sm:$0xff]  ;;  %v28_v2 = vld [vmem:[%s4580_s1 + $0x8] sm:$0xff] }
   0x2   :  { %v31_v1 = vld [vmem:[%s4580_s1 + $0x20] sm:$0xff]  ;;  %v32_v4 = vld [vmem:[%s4580_s1 + $0x28] sm:$0xff] }
   0x3   :  { %v2889_v3 = vcombine.high %v27_v0, %v31_v1  ;;  %v2888_v5 = vcombine.low %v27_v0, %v31_v1  ;;  %v35_v6 = vld [vmem:[%s4580_s1 + $0x40] sm:$0xff]  ;;  %v2891_v8 = vcombine.high %v28_v2, %v32_v4  ;;  %v2890_v9 = vcombine.low %v28_v2, %v32_v4  ;;  %v36_v11 = vld [vmem:[%s4580_s1 + $0x48] sm:$0xff] }
   0x4   :  { %v39_v7 = vld [vmem:[%s4580_s1 + $0x60] sm:$0xff]  ;;  %v40_v12 = vld [vmem:[%s4580_s1 + $0x68] sm:$0xff] }
   0x5   :  { %v2897_v10 = vcombine.high %v35_v6, %v39_v7  ;;  %v43_v13 = vld [vmem:[%s4580_s1 + $0x80] sm:$0xff]  ;;  %2373 = vmatprep.subr.bf16.mxu0 %v2889_v3  ;;  %v2899_v14 = vcombine.high %v36_v11, %v40_v12  ;;  %v44_v16 = vld [vmem:[%s4580_s1 + $0x88] sm:$0xff]  ;;  %2496 = vmatprep.subr.bf16.mxu1 %v2891_v8  ;;  %v2896_v18 = vcombine.low %v35_v6, %v39_v7 }
   0x6   :  { %v47_v15 = vld [vmem:[%s4580_s1 + $0xa0] sm:$0xff]  ;;  %v48_v17 = vld [vmem:[%s4580_s1 + $0xa8] sm:$0xff]  ;;  %2374 = vmatpush1.bf16.msra.mxu0 %v2888_v5  ;;  %2497 = vmatpush1.bf16.msra.mxu1 %v2890_v9  ;;  %v2898_v19 = vcombine.low %v36_v11, %v40_v12 }
   0x7   :  { %2375 = vmatprep.subr.bf16.mxu0 %v2897_v10  ;;  %v2905_v20 = vcombine.high %v43_v13, %v47_v15  ;;  %2498 = vmatprep.subr.bf16.mxu1 %v2899_v14  ;;  %v2907_v21 = vcombine.high %v44_v16, %v48_v17  ;;  %v51_v22 = vld [vmem:[%s4580_s1 + $0xc0] sm:$0xff]  ;;  %v52_v24 = vld [vmem:[%s4580_s1 + $0xc8] sm:$0xff]  ;;  %v2904_v26 = vcombine.low %v43_v13, %v47_v15 }
   0x8   :  { %v55_v23 = vld [vmem:[%s4580_s1 + $0xe0] sm:$0xff]  ;;  %v56_v25 = vld [vmem:[%s4580_s1 + $0xe8] sm:$0xff]  ;;  %v2906_v27 = vcombine.low %v44_v16, %v48_v17 }
   0x9   :  { %v2913_v28 = vcombine.high %v51_v22, %v55_v23  ;;  %v2915_v29 = vcombine.high %v52_v24, %v56_v25  ;;  %v59_v30 = vld [vmem:[%s4580_s1 + $0x100] sm:$0xff]  ;;  %v60_v32 = vld [vmem:[%s4580_s1 + $0x108] sm:$0xff]  ;;  %v2912_v34 = vcombine.low %v51_v22, %v55_v23  ;;  %v2914_v35 = vcombine.low %v52_v24, %v56_v25 }
   0xa   :  { %2376 = vmatpush1.bf16.msra.mxu0 %v2896_v18  ;;  %2499 = vmatpush1.bf16.msra.mxu1 %v2898_v19  ;;  %v63_v31 = vld [vmem:[%s4580_s1 + $0x120] sm:$0xff]  ;;  %v64_v33 = vld [vmem:[%s4580_s1 + $0x128] sm:$0xff] }
   0xb   :  { %2377 = vmatprep.subr.bf16.mxu0 %v2905_v20  ;;  %2500 = vmatprep.subr.bf16.mxu1 %v2907_v21  ;;  %v2921_v36 = vcombine.high %v59_v30, %v63_v31  ;;  %v2923_v37 = vcombine.high %v60_v32, %v64_v33  ;;  %v67_v38 = vld [vmem:[%s4580_s1 + $0x140] sm:$0xff]  ;;  %v68_v40 = vld [vmem:[%s4580_s1 + $0x148] sm:$0xff]  ;;  %v2920_v42 = vcombine.low %v59_v30, %v63_v31 }
   0xc   :  { %v71_v39 = vld [vmem:[%s4580_s1 + $0x160] sm:$0xff]  ;;  %v72_v41 = vld [vmem:[%s4580_s1 + $0x168] sm:$0xff]  ;;  %v2922_v43 = vcombine.low %v60_v32, %v64_v33 }
   0xd   :  { %v2929_v44 = vcombine.high %v67_v38, %v71_v39  ;;  %v2931_v45 = vcombine.high %v68_v40, %v72_v41  ;;  %v75_v46 = vld [vmem:[%s4580_s1 + $0x180] sm:$0xff]  ;;  %v76_v48 = vld [vmem:[%s4580_s1 + $0x188] sm:$0xff]  ;;  %v2928_v50 = vcombine.low %v67_v38, %v71_v39  ;;  %v2930_v51 = vcombine.low %v68_v40, %v72_v41 }
   0xe   :  { %2378 = vmatpush1.bf16.msra.mxu0 %v2904_v26  ;;  %2501 = vmatpush1.bf16.msra.mxu1 %v2906_v27  ;;  %v79_v47 = vld [vmem:[%s4580_s1 + $0x1a0] sm:$0xff]  ;;  %v80_v49 = vld [vmem:[%s4580_s1 + $0x1a8] sm:$0xff] }
   0xf   :  { %2379 = vmatprep.subr.bf16.mxu0 %v2913_v28  ;;  %2502 = vmatprep.subr.bf16.mxu1 %v2915_v29  ;;  %v2937_v52 = vcombine.high %v75_v46, %v79_v47  ;;  %v16_v53 = vld [vmem:[%s4579_s0 + $0x8] sm:$0xff]  ;;  %v2939_v54 = vcombine.high %v76_v48, %v80_v49  ;;  %v83_v55 = vld [vmem:[%s4580_s1 + $0x1c0] sm:$0xff]  ;;  %v2936_v60 = vcombine.low %v75_v46, %v79_v47 }
  0x10   :  { %v87_v56 = vld [vmem:[%s4580_s1 + $0x1e0] sm:$0xff]  ;;  %v3451_v57 = vpack.c.bf16 %v16_v53, %v16_v53  ;;  %v84_v58 = vld [vmem:[%s4580_s1 + $0x1c8] sm:$0xff]  ;;  %v2938_v61 = vcombine.low %v76_v48, %v80_v49 }
  0x11   :  { %v88_v59 = vld [vmem:[%s4580_s1 + $0x1e8] sm:$0xff]  ;;  %v2945_v62 = vcombine.high %v83_v55, %v87_v56  ;;  %v91_v0 = vld [vmem:[%s4580_s1 + $0x200] sm:$0xff]  ;;  %v2944_v4 = vcombine.low %v83_v55, %v87_v56 }
  0x12   :  { %2380 = vmatpush1.bf16.msra.mxu0 %v2912_v34  ;;  %2503 = vmatpush1.bf16.msra.mxu1 %v2914_v35  ;;  %v2947_v63 = vcombine.high %v84_v58, %v88_v59  ;;  %v95_v1 = vld [vmem:[%s4580_s1 + $0x220] sm:$0xff]  ;;  %v92_v2 = vld [vmem:[%s4580_s1 + $0x208] sm:$0xff]  ;;  %v2946_v5 = vcombine.low %v84_v58, %v88_v59 }
  0x13   :  { %2381 = vmatprep.subr.bf16.mxu0 %v2921_v36  ;;  %2504 = vmatprep.subr.bf16.mxu1 %v2923_v37  ;;  %v96_v3 = vld [vmem:[%s4580_s1 + $0x228] sm:$0xff]  ;;  %v2953_v6 = vcombine.high %v91_v0, %v95_v1  ;;  %v99_v8 = vld [vmem:[%s4580_s1 + $0x240] sm:$0xff]  ;;  %v2952_v12 = vcombine.low %v91_v0, %v95_v1 }
  0x14   :  { %2405 = vmatprep.mubr.bf16.mxu0 %v3451_v57  ;;  %2528 = vmatprep.mubr.bf16.mxu1 %v3451_v57  ;;  %v2955_v7 = vcombine.high %v92_v2, %v96_v3  ;;  %v103_v9 = vld [vmem:[%s4580_s1 + $0x260] sm:$0xff]  ;;  %v100_v10 = vld [vmem:[%s4580_s1 + $0x248] sm:$0xff]  ;;  %v2954_v13 = vcombine.low %v92_v2, %v96_v3 }
  0x15   :  { %v104_v11 = vld [vmem:[%s4580_s1 + $0x268] sm:$0xff]  ;;  %v2961_v14 = vcombine.high %v99_v8, %v103_v9  ;;  %v107_v16 = vld [vmem:[%s4580_s1 + $0x280] sm:$0xff]  ;;  %v2960_v20 = vcombine.low %v99_v8, %v103_v9 }
  0x16   :  { %2382 = vmatpush1.bf16.msra.mxu0 %v2920_v42  ;;  %2505 = vmatpush1.bf16.msra.mxu1 %v2922_v43  ;;  %v2963_v15 = vcombine.high %v100_v10, %v104_v11  ;;  %v111_v17 = vld [vmem:[%s4580_s1 + $0x2a0] sm:$0xff]  ;;  %v108_v18 = vld [vmem:[%s4580_s1 + $0x288] sm:$0xff]  ;;  %v2962_v21 = vcombine.low %v100_v10, %v104_v11 }
  0x17   :  { %2383 = vmatprep.subr.bf16.mxu0 %v2929_v44  ;;  %2506 = vmatprep.subr.bf16.mxu1 %v2931_v45  ;;  %v112_v19 = vld [vmem:[%s4580_s1 + $0x2a8] sm:$0xff]  ;;  %v2969_v22 = vcombine.high %v107_v16, %v111_v17  ;;  %v115_v24 = vld [vmem:[%s4580_s1 + $0x2c0] sm:$0xff]  ;;  %v2968_v28 = vcombine.low %v107_v16, %v111_v17 }
  0x18   :  { %v2971_v23 = vcombine.high %v108_v18, %v112_v19  ;;  %v119_v25 = vld [vmem:[%s4580_s1 + $0x2e0] sm:$0xff]  ;;  %v116_v26 = vld [vmem:[%s4580_s1 + $0x2c8] sm:$0xff]  ;;  %v2970_v29 = vcombine.low %v108_v18, %v112_v19 }
  0x19   :  { %v120_v27 = vld [vmem:[%s4580_s1 + $0x2e8] sm:$0xff]  ;;  %v2977_v30 = vcombine.high %v115_v24, %v119_v25  ;;  %v123_v32 = vld [vmem:[%s4580_s1 + $0x300] sm:$0xff]  ;;  %v2976_v36 = vcombine.low %v115_v24, %v119_v25 }
  0x1a   :  { %2384 = vmatpush1.bf16.msra.mxu0 %v2928_v50  ;;  %2507 = vmatpush1.bf16.msra.mxu1 %v2930_v51  ;;  %v2979_v31 = vcombine.high %v116_v26, %v120_v27  ;;  %v127_v33 = vld [vmem:[%s4580_s1 + $0x320] sm:$0xff]  ;;  %v124_v34 = vld [vmem:[%s4580_s1 + $0x308] sm:$0xff]  ;;  %v2978_v37 = vcombine.low %v116_v26, %v120_v27 }
  0x1b   :  { %2385 = vmatprep.subr.bf16.mxu0 %v2937_v52  ;;  %2508 = vmatprep.subr.bf16.mxu1 %v2939_v54  ;;  %v128_v35 = vld [vmem:[%s4580_s1 + $0x328] sm:$0xff]  ;;  %v2985_v38 = vcombine.high %v123_v32, %v127_v33  ;;  %v131_v40 = vld [vmem:[%s4580_s1 + $0x340] sm:$0xff]  ;;  %v2984_v44 = vcombine.low %v123_v32, %v127_v33 }
  0x1c   :  { %v2987_v39 = vcombine.high %v124_v34, %v128_v35  ;;  %v135_v41 = vld [vmem:[%s4580_s1 + $0x360] sm:$0xff]  ;;  %v132_v42 = vld [vmem:[%s4580_s1 + $0x348] sm:$0xff]  ;;  %v2986_v45 = vcombine.low %v124_v34, %v128_v35 }
  0x1d   :  { %v136_v43 = vld [vmem:[%s4580_s1 + $0x368] sm:$0xff]  ;;  %v2993_v46 = vcombine.high %v131_v40, %v135_v41  ;;  %v139_v48 = vld [vmem:[%s4580_s1 + $0x380] sm:$0xff]  ;;  %v2992_v52 = vcombine.low %v131_v40, %v135_v41 }
  0x1e   :  { %2386 = vmatpush1.bf16.msra.mxu0 %v2936_v60  ;;  %2509 = vmatpush1.bf16.msra.mxu1 %v2938_v61  ;;  %v2995_v47 = vcombine.high %v132_v42, %v136_v43  ;;  %v143_v49 = vld [vmem:[%s4580_s1 + $0x3a0] sm:$0xff]  ;;  %v140_v50 = vld [vmem:[%s4580_s1 + $0x388] sm:$0xff]  ;;  %v2994_v53 = vcombine.low %v132_v42, %v136_v43 }
  0x1f   :  { %2387 = vmatprep.subr.bf16.mxu0 %v2945_v62  ;;  %2510 = vmatprep.subr.bf16.mxu1 %v2947_v63  ;;  %v144_v51 = vld [vmem:[%s4580_s1 + $0x3a8] sm:$0xff]  ;;  %v3001_v54 = vcombine.high %v139_v48, %v143_v49  ;;  %v147_v56 = vld [vmem:[%s4580_s1 + $0x3c0] sm:$0xff]  ;;  %v3000_v61 = vcombine.low %v139_v48, %v143_v49 }
  0x20   :  { %v3003_v55 = vcombine.high %v140_v50, %v144_v51  ;;  %v151_v58 = vld [vmem:[%s4580_s1 + $0x3e0] sm:$0xff]  ;;  %v148_v59 = vld [vmem:[%s4580_s1 + $0x3c8] sm:$0xff]  ;;  %v3002_v62 = vcombine.low %v140_v50, %v144_v51 }
  0x21   :  { %v152_v60 = vld [vmem:[%s4580_s1 + $0x3e8] sm:$0xff]  ;;  %v3009_v63 = vcombine.high %v147_v56, %v151_v58  ;;  %v155_v1 = vld [vmem:[%s4580_s1 + $0x400] sm:$0xff] }
  0x22   :  { %2388 = vmatpush1.bf16.msra.mxu0 %v2944_v4  ;;  %2511 = vmatpush1.bf16.msra.mxu1 %v2946_v5  ;;  %v3011_v0 = vcombine.high %v148_v59, %v152_v60  ;;  %v159_v2 = vld [vmem:[%s4580_s1 + $0x420] sm:$0xff]  ;;  %v156_v3 = vld [vmem:[%s4580_s1 + $0x408] sm:$0xff]  ;;  %v3008_v5 = vcombine.low %v147_v56, %v151_v58 }
  0x23   :  { %2389 = vmatprep.subr.bf16.mxu0 %v2953_v6  ;;  %2512 = vmatprep.subr.bf16.mxu1 %v2955_v7  ;;  %v160_v4 = vld [vmem:[%s4580_s1 + $0x428] sm:$0xff]  ;;  %v15_v6 = vld [vmem:[%s4579_s0] sm:$0xff]  ;;  %v3010_v7 = vcombine.low %v148_v59, %v152_v60  ;;  %v3017_v8 = vcombine.high %v155_v1, %v159_v2  ;;  %v3016_v16 = vcombine.low %v155_v1, %v159_v2 }
  0x24   :  { %v3019_v9 = vcombine.high %v156_v3, %v160_v4  ;;  %v163_v10 = vld [vmem:[%s4580_s1 + $0x440] sm:$0xff]  ;;  %v3018_v17 = vcombine.low %v156_v3, %v160_v4  ;;  %v176_v24 = vld [vmem:[%s4580_s1 + $0x4a8] sm:$0xff] }
  0x25   :  { %v167_v11 = vld [vmem:[%s4580_s1 + $0x460] sm:$0xff] }
  0x26   :  { %2390 = vmatpush1.bf16.msra.mxu0 %v2952_v12  ;;  %2513 = vmatpush1.bf16.msra.mxu1 %v2954_v13  ;;  %v3578_v12 = vpack.c.bf16 %v15_v6, %v15_v6  ;;  %v164_v13 = vld [vmem:[%s4580_s1 + $0x448] sm:$0xff]  ;;  %v3025_v18 = vcombine.high %v163_v10, %v167_v11 }
  0x27   :  { %2391 = vmatprep.subr.bf16.mxu0 %v2961_v14  ;;  %2514 = vmatprep.subr.bf16.mxu1 %v2963_v15  ;;  %v168_v14 = vld [vmem:[%s4580_s1 + $0x468] sm:$0xff]  ;;  %v18_v15 = vld [vmem:[%s4579_s0 + $0x18] sm:$0xff] }
  0x28   :  { %v3027_v19 = vcombine.high %v164_v13, %v168_v14 }
  0x2a   :  { %2392 = vmatpush1.bf16.msra.mxu0 %v2960_v20  ;;  %2515 = vmatpush1.bf16.msra.mxu1 %v2962_v21  ;;  %v171_v20 = vld [vmem:[%s4580_s1 + $0x480] sm:$0xff] }
  0x2b   :  { %2393 = vmatprep.subr.bf16.mxu0 %v2969_v22  ;;  %2516 = vmatprep.subr.bf16.mxu1 %v2971_v23  ;;  %v175_v21 = vld [vmem:[%s4580_s1 + $0x4a0] sm:$0xff]  ;;  %v3595_v22 = vpack.c.bf16 %v18_v15, %v18_v15  ;;  %v172_v23 = vld [vmem:[%s4580_s1 + $0x488] sm:$0xff] }
  0x2e   :  { %2394 = vmatpush1.bf16.msra.mxu0 %v2968_v28  ;;  %2517 = vmatpush1.bf16.msra.mxu1 %v2970_v29 }
  0x2f   :  { %2395 = vmatprep.subr.bf16.mxu0 %v2977_v30  ;;  %2518 = vmatprep.subr.bf16.mxu1 %v2979_v31 }
  0x32   :  { %2396 = vmatpush1.bf16.msra.mxu0 %v2976_v36  ;;  %2519 = vmatpush1.bf16.msra.mxu1 %v2978_v37 }
  0x33   :  { %2397 = vmatprep.subr.bf16.mxu0 %v2985_v38  ;;  %2520 = vmatprep.subr.bf16.mxu1 %v2987_v39 }
  0x36   :  { %2398 = vmatpush1.bf16.msra.mxu0 %v2984_v44  ;;  %2521 = vmatpush1.bf16.msra.mxu1 %v2986_v45 }
  0x37   :  { %2399 = vmatprep.subr.bf16.mxu0 %v2993_v46  ;;  %2522 = vmatprep.subr.bf16.mxu1 %v2995_v47 }
  0x3a   :  { %2400 = vmatpush1.bf16.msra.mxu0 %v2992_v52  ;;  %2523 = vmatpush1.bf16.msra.mxu1 %v2994_v53 }
  0x3b   :  { %2401 = vmatprep.subr.bf16.mxu0 %v3001_v54  ;;  %2524 = vmatprep.subr.bf16.mxu1 %v3003_v55 }
  0x3e   :  { %2402 = vmatpush1.bf16.msra.mxu0 %v3000_v61  ;;  %2525 = vmatpush1.bf16.msra.mxu1 %v3002_v62 }
  0x3f   :  { %2403 = vmatprep.subr.bf16.mxu0 %v3009_v63  ;;  %2526 = vmatprep.subr.bf16.mxu1 %v3011_v0 }
  0x42   :  { %2404 = vmatpush1.bf16.msra.mxu0 %v3008_v5  ;;  %2527 = vmatpush1.bf16.msra.mxu1 %v3010_v7 }
  0x43   :  { %2414 = vmatprep.subr.bf16.mxu0 %v3017_v8  ;;  %2537 = vmatprep.subr.bf16.mxu1 %v3019_v9 }
  0x45   :  { %2406 = vmatmul.mubr.bf16.vlgmr.msra.gmra.mrb[0].mxu0 %v3578_v12 }
  0x46   :  { %8 = vsyncpa [#allocation3], 0  ;;  %2415 = vmatpush1.bf16.msra.mxu0 %v3016_v16  ;;  %2529 = vmatmul.mubr.bf16.vlgmr.msra.gmra.mrb[0].mxu1 %v3578_v12  ;;  %v3024_v25 = vcombine.low %v163_v10, %v167_v11  ;;  %v3026_v26 = vcombine.low %v164_v13, %v168_v14  ;;  %v3033_v27 = vcombine.high %v171_v20, %v175_v21  ;;  %v179_v29 = vld [vmem:[%s4580_s1 + $0x4c0] sm:$0xff]  ;;  %v180_v31 = vld [vmem:[%s4580_s1 + $0x4c8] sm:$0xff]  ;;  %vm2872_vm0 = vcmask 850944  }
  0x47   :  { %2538 = vmatpush1.bf16.msra.mxu1 %v3018_v17  ;;  %2416 = vmatprep.subr.bf16.mxu0 %v3025_v18  ;;  %v3035_v28 = vcombine.high %v172_v23, %v176_v24  ;;  %v183_v30 = vld [vmem:[%s4580_s1 + $0x4e0] sm:$0xff]  ;;  %v184_v32 = vld [vmem:[%s4580_s1 + $0x4e8] sm:$0xff]  ;;  %v3032_v33 = vcombine.low %v171_v20, %v175_v21  ;;  %v3034_v34 = vcombine.low %v172_v23, %v176_v24 }
  0x48   :  { %2539 = vmatprep.subr.bf16.mxu1 %v3027_v19  ;;  %2446 = vmatprep.mubr.bf16.mxu0 %v3595_v22  ;;  %v3041_v35 = vcombine.high %v179_v29, %v183_v30  ;;  %v3043_v36 = vcombine.high %v180_v31, %v184_v32  ;;  %v187_v37 = vld [vmem:[%s4580_s1 + $0x500] sm:$0xff]  ;;  %v188_v39 = vld [vmem:[%s4580_s1 + $0x508] sm:$0xff]  ;;  %v3040_v41 = vcombine.low %v179_v29, %v183_v30 }
  0x49   :  { %2569 = vmatprep.mubr.bf16.mxu1 %v3595_v22  ;;  %v191_v38 = vld [vmem:[%s4580_s1 + $0x520] sm:$0xff]  ;;  %v192_v40 = vld [vmem:[%s4580_s1 + $0x528] sm:$0xff]  ;;  %v3042_v42 = vcombine.low %v180_v31, %v184_v32 }
  0x4a   :  { %2417 = vmatpush1.bf16.msra.mxu0 %v3024_v25  ;;  %v3049_v43 = vcombine.high %v187_v37, %v191_v38  ;;  %v3051_v44 = vcombine.high %v188_v39, %v192_v40  ;;  %v195_v45 = vld [vmem:[%s4580_s1 + $0x540] sm:$0xff]  ;;  %v196_v47 = vld [vmem:[%s4580_s1 + $0x548] sm:$0xff]  ;;  %v3048_v49 = vcombine.low %v187_v37, %v191_v38  ;;  %v3050_v50 = vcombine.low %v188_v39, %v192_v40 }
  0x4b   :  { %2540 = vmatpush1.bf16.msra.mxu1 %v3026_v26  ;;  %2418 = vmatprep.subr.bf16.mxu0 %v3033_v27  ;;  %v199_v46 = vld [vmem:[%s4580_s1 + $0x560] sm:$0xff]  ;;  %v200_v48 = vld [vmem:[%s4580_s1 + $0x568] sm:$0xff] }
  0x4c   :  { %2541 = vmatprep.subr.bf16.mxu1 %v3035_v28  ;;  %v3057_v51 = vcombine.high %v195_v45, %v199_v46  ;;  %v3059_v52 = vcombine.high %v196_v47, %v200_v48  ;;  %v203_v53 = vld [vmem:[%s4580_s1 + $0x580] sm:$0xff]  ;;  %v204_v55 = vld [vmem:[%s4580_s1 + $0x588] sm:$0xff]  ;;  %v3056_v58 = vcombine.low %v195_v45, %v199_v46  ;;  %v3058_v59 = vcombine.low %v196_v47, %v200_v48 }
  0x4d   :  { %v207_v54 = vld [vmem:[%s4580_s1 + $0x5a0] sm:$0xff]  ;;  %v208_v56 = vld [vmem:[%s4580_s1 + $0x5a8] sm:$0xff] }
  0x4e   :  { %2419 = vmatpush1.bf16.msra.mxu0 %v3032_v33  ;;  %v3065_v60 = vcombine.high %v203_v53, %v207_v54  ;;  %v3067_v61 = vcombine.high %v204_v55, %v208_v56  ;;  %v211_v62 = vld [vmem:[%s4580_s1 + $0x5c0] sm:$0xff]  ;;  %v212_v0 = vld [vmem:[%s4580_s1 + $0x5c8] sm:$0xff]  ;;  %v3064_v2 = vcombine.low %v203_v53, %v207_v54  ;;  %v3066_v3 = vcombine.low %v204_v55, %v208_v56 }
  0x4f   :  { %2542 = vmatpush1.bf16.msra.mxu1 %v3034_v34  ;;  %2420 = vmatprep.subr.bf16.mxu0 %v3041_v35  ;;  %v215_v63 = vld [vmem:[%s4580_s1 + $0x5e0] sm:$0xff]  ;;  %v216_v1 = vld [vmem:[%s4580_s1 + $0x5e8] sm:$0xff] }
  0x50   :  { %2543 = vmatprep.subr.bf16.mxu1 %v3043_v36  ;;  %v3073_v4 = vcombine.high %v211_v62, %v215_v63  ;;  %v3075_v5 = vcombine.high %v212_v0, %v216_v1  ;;  %v219_v6 = vld [vmem:[%s4580_s1 + $0x600] sm:$0xff]  ;;  %v220_v8 = vld [vmem:[%s4580_s1 + $0x608] sm:$0xff]  ;;  %v3072_v10 = vcombine.low %v211_v62, %v215_v63  ;;  %v3074_v11 = vcombine.low %v212_v0, %v216_v1 }
  0x51   :  { %v223_v7 = vld [vmem:[%s4580_s1 + $0x620] sm:$0xff]  ;;  %v224_v9 = vld [vmem:[%s4580_s1 + $0x628] sm:$0xff] }
  0x52   :  { %2421 = vmatpush1.bf16.msra.mxu0 %v3040_v41  ;;  %v3081_v13 = vcombine.high %v219_v6, %v223_v7  ;;  %v3083_v14 = vcombine.high %v220_v8, %v224_v9  ;;  %v227_v15 = vld [vmem:[%s4580_s1 + $0x640] sm:$0xff]  ;;  %v228_v17 = vld [vmem:[%s4580_s1 + $0x648] sm:$0xff]  ;;  %v3080_v19 = vcombine.low %v219_v6, %v223_v7  ;;  %v3082_v20 = vcombine.low %v220_v8, %v224_v9 }
  0x53   :  { %2544 = vmatpush1.bf16.msra.mxu1 %v3042_v42  ;;  %2422 = vmatprep.subr.bf16.mxu0 %v3049_v43  ;;  %v231_v16 = vld [vmem:[%s4580_s1 + $0x660] sm:$0xff]  ;;  %v232_v18 = vld [vmem:[%s4580_s1 + $0x668] sm:$0xff] }
  0x54   :  { %2545 = vmatprep.subr.bf16.mxu1 %v3051_v44  ;;  %v3089_v21 = vcombine.high %v227_v15, %v231_v16  ;;  %v3091_v23 = vcombine.high %v228_v17, %v232_v18  ;;  %v235_v24 = vld [vmem:[%s4580_s1 + $0x680] sm:$0xff]  ;;  %v236_v26 = vld [vmem:[%s4580_s1 + $0x688] sm:$0xff]  ;;  %v3088_v28 = vcombine.low %v227_v15, %v231_v16  ;;  %v3090_v29 = vcombine.low %v228_v17, %v232_v18  ;;  %v17_v15 = vld [vmem:[%s4579_s0 + $0x10] sm:$0xff] }
  0x55   :  { %v239_v25 = vld [vmem:[%s4580_s1 + $0x6a0] sm:$0xff]  ;;  %v240_v27 = vld [vmem:[%s4580_s1 + $0x6a8] sm:$0xff] }
  0x56   :  { %2423 = vmatpush1.bf16.msra.mxu0 %v3048_v49  ;;  %v3097_v30 = vcombine.high %v235_v24, %v239_v25  ;;  %v3099_v31 = vcombine.high %v236_v26, %v240_v27  ;;  %v243_v32 = vld [vmem:[%s4580_s1 + $0x6c0] sm:$0xff]  ;;  %v244_v34 = vld [vmem:[%s4580_s1 + $0x6c8] sm:$0xff]  ;;  %v3096_v36 = vcombine.low %v235_v24, %v239_v25  ;;  %v3098_v37 = vcombine.low %v236_v26, %v240_v27 }
  0x57   :  { %2546 = vmatpush1.bf16.msra.mxu1 %v3050_v50  ;;  %2424 = vmatprep.subr.bf16.mxu0 %v3057_v51  ;;  %v247_v33 = vld [vmem:[%s4580_s1 + $0x6e0] sm:$0xff]  ;;  %v248_v35 = vld [vmem:[%s4580_s1 + $0x6e8] sm:$0xff] }
  0x58   :  { %2547 = vmatprep.subr.bf16.mxu1 %v3059_v52  ;;  %v3105_v38 = vcombine.high %v243_v32, %v247_v33  ;;  %v3107_v39 = vcombine.high %v244_v34, %v248_v35  ;;  %v251_v40 = vld [vmem:[%s4580_s1 + $0x700] sm:$0xff]  ;;  %v252_v42 = vld [vmem:[%s4580_s1 + $0x708] sm:$0xff]  ;;  %v3104_v44 = vcombine.low %v243_v32, %v247_v33  ;;  %v3106_v45 = vcombine.low %v244_v34, %v248_v35 }
  0x59   :  { %v255_v41 = vld [vmem:[%s4580_s1 + $0x720] sm:$0xff]  ;;  %v256_v43 = vld [vmem:[%s4580_s1 + $0x728] sm:$0xff] }
  0x5a   :  { %2425 = vmatpush1.bf16.msra.mxu0 %v3056_v58  ;;  %v3113_v46 = vcombine.high %v251_v40, %v255_v41  ;;  %v3115_v47 = vcombine.high %v252_v42, %v256_v43  ;;  %v259_v48 = vld [vmem:[%s4580_s1 + $0x740] sm:$0xff]  ;;  %v260_v50 = vld [vmem:[%s4580_s1 + $0x748] sm:$0xff]  ;;  %v3112_v52 = vcombine.low %v251_v40, %v255_v41  ;;  %v3114_v53 = vcombine.low %v252_v42, %v256_v43 }
  0x5b   :  { %2548 = vmatpush1.bf16.msra.mxu1 %v3058_v59  ;;  %2426 = vmatprep.subr.bf16.mxu0 %v3065_v60  ;;  %v263_v49 = vld [vmem:[%s4580_s1 + $0x760] sm:$0xff]  ;;  %v264_v51 = vld [vmem:[%s4580_s1 + $0x768] sm:$0xff] }
  0x5c   :  { %2549 = vmatprep.subr.bf16.mxu1 %v3067_v61  ;;  %v3121_v54 = vcombine.high %v259_v48, %v263_v49  ;;  %v3123_v55 = vcombine.high %v260_v50, %v264_v51  ;;  %v267_v56 = vld [vmem:[%s4580_s1 + $0x780] sm:$0xff]  ;;  %v268_v59 = vld [vmem:[%s4580_s1 + $0x788] sm:$0xff]  ;;  %v3120_v61 = vcombine.low %v259_v48, %v263_v49  ;;  %v3122_v62 = vcombine.low %v260_v50, %v264_v51 }
  0x5d   :  { %v271_v58 = vld [vmem:[%s4580_s1 + $0x7a0] sm:$0xff]  ;;  %v272_v60 = vld [vmem:[%s4580_s1 + $0x7a8] sm:$0xff] }
  0x5e   :  { %2427 = vmatpush1.bf16.msra.mxu0 %v3064_v2  ;;  %v3129_v63 = vcombine.high %v267_v56, %v271_v58  ;;  %v3131_v0 = vcombine.high %v268_v59, %v272_v60  ;;  %v275_v1 = vld [vmem:[%s4580_s1 + $0x7c0] sm:$0xff]  ;;  %v3130_v6 = vcombine.low %v268_v59, %v272_v60  ;;  %v296_v24 = vld [vmem:[%s4580_s1 + $0x868] sm:$0xff] }
  0x5f   :  { %2550 = vmatpush1.bf16.msra.mxu1 %v3066_v3  ;;  %2428 = vmatprep.subr.bf16.mxu0 %v3073_v4  ;;  %v279_v2 = vld [vmem:[%s4580_s1 + $0x7e0] sm:$0xff]  ;;  %v276_v3 = vld [vmem:[%s4580_s1 + $0x7c8] sm:$0xff] }
  0x60   :  { %2551 = vmatprep.subr.bf16.mxu1 %v3075_v5  ;;  %v280_v4 = vld [vmem:[%s4580_s1 + $0x7e8] sm:$0xff]  ;;  %v3128_v5 = vcombine.low %v267_v56, %v271_v58  ;;  %v3137_v7 = vcombine.high %v275_v1, %v279_v2  ;;  %v283_v9 = vld [vmem:[%s4580_s1 + $0x800] sm:$0xff] }
  0x61   :  { %v3139_v8 = vcombine.high %v276_v3, %v280_v4  ;;  %v3138_v16 = vcombine.low %v276_v3, %v280_v4  ;;  %v20_v25 = vld [vmem:[%s4579_s0 + $0x28] sm:$0xff]  ;;  %v311_v40 = vld [vmem:[%s4580_s1 + $0x8e0] sm:$0xff] }
  0x62   :  { %2429 = vmatpush1.bf16.msra.mxu0 %v3072_v10  ;;  %v287_v10 = vld [vmem:[%s4580_s1 + $0x820] sm:$0xff]  ;;  %v3801_v32 = vpack.c.bf16 %v20_v25, %v20_v25  ;;  %v300_v33 = vld [vmem:[%s4580_s1 + $0x888] sm:$0xff] }
  0x63   :  { %2552 = vmatpush1.bf16.msra.mxu1 %v3074_v11  ;;  %2430 = vmatprep.subr.bf16.mxu0 %v3081_v13  ;;  %v284_v11 = vld [vmem:[%s4580_s1 + $0x808] sm:$0xff]  ;;  %v3145_v17 = vcombine.high %v283_v9, %v287_v10  ;;  %v3144_v26 = vcombine.low %v283_v9, %v287_v10  ;;  %v319_v48 = vld [vmem:[%s4580_s1 + $0x920] sm:$0xff] }
  0x64   :  { %2553 = vmatprep.subr.bf16.mxu1 %v3083_v14  ;;  %v288_v13 = vld [vmem:[%s4580_s1 + $0x828] sm:$0xff]  ;;  %v3136_v14 = vcombine.low %v275_v1, %v279_v2  ;;  %v327_v56 = vld [vmem:[%s4580_s1 + $0x960] sm:$0xff] }
  0x65   :  { %v3147_v18 = vcombine.high %v284_v11, %v288_v13  ;;  %v3146_v27 = vcombine.low %v284_v11, %v288_v13  ;;  %v304_v34 = vld [vmem:[%s4580_s1 + $0x8a8] sm:$0xff]  ;;  %v335_v1 = vld [vmem:[%s4580_s1 + $0x9a0] sm:$0xff] }
  0x66   :  { %2431 = vmatpush1.bf16.msra.mxu0 %v3080_v19  ;;  %v291_v19 = vld [vmem:[%s4580_s1 + $0x840] sm:$0xff]  ;;  %v308_v41 = vld [vmem:[%s4580_s1 + $0x8c8] sm:$0xff] }
  0x67   :  { %2554 = vmatpush1.bf16.msra.mxu1 %v3082_v20  ;;  %2432 = vmatprep.subr.bf16.mxu0 %v3089_v21  ;;  %v295_v20 = vld [vmem:[%s4580_s1 + $0x860] sm:$0xff]  ;;  %v3784_v21 = vpack.c.bf16 %v17_v15, %v17_v15  ;;  %v312_v42 = vld [vmem:[%s4580_s1 + $0x8e8] sm:$0xff] }
  0x68   :  { %2555 = vmatprep.subr.bf16.mxu1 %v3091_v23  ;;  %v292_v23 = vld [vmem:[%s4580_s1 + $0x848] sm:$0xff]  ;;  %v3152_v35 = vcombine.low %v291_v19, %v295_v20  ;;  %v343_v9 = vld [vmem:[%s4580_s1 + $0x9e0] sm:$0xff] }
  0x69   :  { %v316_v49 = vld [vmem:[%s4580_s1 + $0x908] sm:$0xff] }
  0x6a   :  { %2433 = vmatpush1.bf16.msra.mxu0 %v3088_v28  ;;  %v3153_v28 = vcombine.high %v291_v19, %v295_v20  ;;  %v320_v50 = vld [vmem:[%s4580_s1 + $0x928] sm:$0xff] }
  0x6b   :  { %2556 = vmatpush1.bf16.msra.mxu1 %v3090_v29  ;;  %2434 = vmatprep.subr.bf16.mxu0 %v3097_v30  ;;  %v3155_v29 = vcombine.high %v292_v23, %v296_v24  ;;  %v299_v30 = vld [vmem:[%s4580_s1 + $0x880] sm:$0xff]  ;;  %v324_v58 = vld [vmem:[%s4580_s1 + $0x948] sm:$0xff] }
  0x6c   :  { %2557 = vmatprep.subr.bf16.mxu1 %v3099_v31  ;;  %v303_v31 = vld [vmem:[%s4580_s1 + $0x8a0] sm:$0xff]  ;;  %v328_v59 = vld [vmem:[%s4580_s1 + $0x968] sm:$0xff] }
  0x6d   :  { %v3160_v43 = vcombine.low %v299_v30, %v303_v31  ;;  %v332_v2 = vld [vmem:[%s4580_s1 + $0x988] sm:$0xff] }
  0x6e   :  { %2435 = vmatpush1.bf16.msra.mxu0 %v3096_v36  ;;  %v3154_v36 = vcombine.low %v292_v23, %v296_v24  ;;  %v336_v3 = vld [vmem:[%s4580_s1 + $0x9a8] sm:$0xff] }
  0x6f   :  { %2558 = vmatpush1.bf16.msra.mxu1 %v3098_v37  ;;  %2436 = vmatprep.subr.bf16.mxu0 %v3105_v38  ;;  %v3161_v37 = vcombine.high %v299_v30, %v303_v31  ;;  %v3163_v38 = vcombine.high %v300_v33, %v304_v34  ;;  %v340_v10 = vld [vmem:[%s4580_s1 + $0x9c8] sm:$0xff] }
  0x70   :  { %2559 = vmatprep.subr.bf16.mxu1 %v3107_v39  ;;  %v307_v39 = vld [vmem:[%s4580_s1 + $0x8c0] sm:$0xff]  ;;  %v344_v11 = vld [vmem:[%s4580_s1 + $0x9e8] sm:$0xff] }
  0x71   :  { %v3168_v51 = vcombine.low %v307_v39, %v311_v40  ;;  %v348_v19 = vld [vmem:[%s4580_s1 + $0xa08] sm:$0xff]  ;;  %v3202_v24 = vcombine.low %v340_v10, %v344_v11 }
  0x72   :  { %2437 = vmatpush1.bf16.msra.mxu0 %v3104_v44  ;;  %v3162_v44 = vcombine.low %v300_v33, %v304_v34  ;;  %v352_v20 = vld [vmem:[%s4580_s1 + $0xa28] sm:$0xff] }
  0x73   :  { %2560 = vmatpush1.bf16.msra.mxu1 %v3106_v45  ;;  %2438 = vmatprep.subr.bf16.mxu0 %v3113_v46  ;;  %v3169_v45 = vcombine.high %v307_v39, %v311_v40  ;;  %v3171_v46 = vcombine.high %v308_v41, %v312_v42  ;;  %v360_v30 = vld [vmem:[%s4580_s1 + $0xa68] sm:$0xff]  ;;  %v3210_v33 = vcombine.low %v348_v19, %v352_v20 }
  0x74   :  { %2561 = vmatprep.subr.bf16.mxu1 %v3115_v47  ;;  %v315_v47 = vld [vmem:[%s4580_s1 + $0x900] sm:$0xff]  ;;  %v368_v39 = vld [vmem:[%s4580_s1 + $0xaa8] sm:$0xff] }
  0x75   :  { %v3176_v60 = vcombine.low %v315_v47, %v319_v48 }
  0x76   :  { %2439 = vmatpush1.bf16.msra.mxu0 %v3112_v52  ;;  %v3170_v52 = vcombine.low %v308_v41, %v312_v42 }
  0x77   :  { %2562 = vmatpush1.bf16.msra.mxu1 %v3114_v53  ;;  %2440 = vmatprep.subr.bf16.mxu0 %v3121_v54  ;;  %v3177_v53 = vcombine.high %v315_v47, %v319_v48  ;;  %v3179_v54 = vcombine.high %v316_v49, %v320_v50  ;;  %v376_v47 = vld [vmem:[%s4580_s1 + $0xae8] sm:$0xff] }
  0x78   :  { %2563 = vmatprep.subr.bf16.mxu1 %v3123_v55  ;;  %v323_v55 = vld [vmem:[%s4580_s1 + $0x940] sm:$0xff] }
  0x79   :  { %v3184_v4 = vcombine.low %v323_v55, %v327_v56 }
  0x7a   :  { %2441 = vmatpush1.bf16.msra.mxu0 %v3120_v61  ;;  %v3178_v61 = vcombine.low %v316_v49, %v320_v50 }
  0x7b   :  { %2564 = vmatpush1.bf16.msra.mxu1 %v3122_v62  ;;  %2442 = vmatprep.subr.bf16.mxu0 %v3129_v63  ;;  %v3185_v62 = vcombine.high %v323_v55, %v327_v56  ;;  %v3187_v63 = vcombine.high %v324_v58, %v328_v59  ;;  %v384_v55 = vld [vmem:[%s4580_s1 + $0xb28] sm:$0xff] }
  0x7c   :  { %2565 = vmatprep.subr.bf16.mxu1 %v3131_v0  ;;  %v331_v0 = vld [vmem:[%s4580_s1 + $0x980] sm:$0xff] }
  0x7d   :  { %v3192_v13 = vcombine.low %v331_v0, %v335_v1 }
  0x7e   :  { %2443 = vmatpush1.bf16.msra.mxu0 %v3128_v5  ;;  %v3186_v5 = vcombine.low %v324_v58, %v328_v59 }
  0x7f   :  { %2566 = vmatpush1.bf16.msra.mxu1 %v3130_v6  ;;  %2444 = vmatprep.subr.bf16.mxu0 %v3137_v7  ;;  %v3193_v6 = vcombine.high %v331_v0, %v335_v1  ;;  %v3195_v7 = vcombine.high %v332_v2, %v336_v3  ;;  %v392_v0 = vld [vmem:[%s4580_s1 + $0xb68] sm:$0xff] }
  0x80   :  { %2567 = vmatprep.subr.bf16.mxu1 %v3139_v8  ;;  %v339_v8 = vld [vmem:[%s4580_s1 + $0x9c0] sm:$0xff] }
  0x81   :  { %v3201_v15 = vcombine.high %v339_v8, %v343_v9  ;;  %v3200_v23 = vcombine.low %v339_v8, %v343_v9  ;;  %v400_v8 = vld [vmem:[%s4580_s1 + $0xba8] sm:$0xff] }
  0x82   :  { %2445 = vmatpush1.bf16.msra.mxu0 %v3136_v14  ;;  %v3194_v14 = vcombine.low %v332_v2, %v336_v3 }
  0x83   :  { %2568 = vmatpush1.bf16.msra.mxu1 %v3138_v16  ;;  %2455 = vmatprep.subr.bf16.mxu0 %v3145_v17  ;;  %v3203_v16 = vcombine.high %v340_v10, %v344_v11  ;;  %v347_v17 = vld [vmem:[%s4580_s1 + $0xa00] sm:$0xff] }
  0x84   :  { %2578 = vmatprep.subr.bf16.mxu1 %v3147_v18  ;;  %v351_v18 = vld [vmem:[%s4580_s1 + $0xa20] sm:$0xff] }
  0x85   :  { %2447 = vmatmul.mubr.bf16.vlgmr.msra.gmra.mrb[0].mxu0 %v3784_v21  ;;  %v3209_v25 = vcombine.high %v347_v17, %v351_v18  ;;  %v3208_v31 = vcombine.low %v347_v17, %v351_v18  ;;  %v408_v17 = vld [vmem:[%s4580_s1 + $0xbe8] sm:$0xff] }
  0x86   :  { %2456 = vmatpush1.bf16.msra.mxu0 %v3144_v26  ;;  %2570 = vmatmul.mubr.bf16.vlgmr.msra.gmra.mrb[0].mxu1 %v3784_v21  ;;  %v3211_v26 = vcombine.high %v348_v19, %v352_v20 }
  0x87   :  { %2579 = vmatpush1.bf16.msra.mxu1 %v3146_v27  ;;  %2457 = vmatprep.subr.bf16.mxu0 %v3153_v28  ;;  %v355_v27 = vld [vmem:[%s4580_s1 + $0xa40] sm:$0xff] }
  0x88   :  { %2580 = vmatprep.subr.bf16.mxu1 %v3155_v29  ;;  %2487 = vmatprep.mubr.bf16.mxu0 %v3801_v32  ;;  %v359_v28 = vld [vmem:[%s4580_s1 + $0xa60] sm:$0xff]  ;;  %v356_v29 = vld [vmem:[%s4580_s1 + $0xa48] sm:$0xff] }
  0x89   :  { %2610 = vmatprep.mubr.bf16.mxu1 %v3801_v32  ;;  %v3217_v34 = vcombine.high %v355_v27, %v359_v28  ;;  %v3216_v40 = vcombine.low %v355_v27, %v359_v28  ;;  %v3218_v41 = vcombine.low %v356_v29, %v360_v30  ;;  %v34_v27 = vld [vmem:[%s4580_s1 + $0x38] sm:$0xff] }
  0x8a   :  { %2458 = vmatpush1.bf16.msra.mxu0 %v3152_v35  ;;  %v3219_v35 = vcombine.high %v356_v29, %v360_v30  ;;  %v19_v29 = vld [vmem:[%s4579_s0 + $0x20] sm:$0xff] }
  0x8b   :  { %2581 = vmatpush1.bf16.msra.mxu1 %v3154_v36  ;;  %2459 = vmatprep.subr.bf16.mxu0 %v3161_v37  ;;  %v363_v36 = vld [vmem:[%s4580_s1 + $0xa80] sm:$0xff] }
  0x8c   :  { %2582 = vmatprep.subr.bf16.mxu1 %v3163_v38  ;;  %v367_v37 = vld [vmem:[%s4580_s1 + $0xaa0] sm:$0xff]  ;;  %v364_v38 = vld [vmem:[%s4580_s1 + $0xa88] sm:$0xff] }
  0x8d   :  { %v3225_v42 = vcombine.high %v363_v36, %v367_v37  ;;  %v3224_v48 = vcombine.low %v363_v36, %v367_v37  ;;  %v3226_v49 = vcombine.low %v364_v38, %v368_v39  ;;  %v3990_v36 = vpack.c.bf16 %v19_v29, %v19_v29  ;;  %v38_v37 = vld [vmem:[%s4580_s1 + $0x58] sm:$0xff] }
  0x8e   :  { %2460 = vmatpush1.bf16.msra.mxu0 %v3160_v43  ;;  %v3227_v43 = vcombine.high %v364_v38, %v368_v39  ;;  %v42_v38 = vld [vmem:[%s4580_s1 + $0x78] sm:$0xff] }
  0x8f   :  { %2583 = vmatpush1.bf16.msra.mxu1 %v3162_v44  ;;  %2461 = vmatprep.subr.bf16.mxu0 %v3169_v45  ;;  %v371_v44 = vld [vmem:[%s4580_s1 + $0xac0] sm:$0xff] }
  0x90   :  { %2584 = vmatprep.subr.bf16.mxu1 %v3171_v46  ;;  %v375_v45 = vld [vmem:[%s4580_s1 + $0xae0] sm:$0xff]  ;;  %v372_v46 = vld [vmem:[%s4580_s1 + $0xac8] sm:$0xff] }
  0x91   :  { %v3233_v50 = vcombine.high %v371_v44, %v375_v45  ;;  %v3232_v56 = vcombine.low %v371_v44, %v375_v45  ;;  %v3234_v58 = vcombine.low %v372_v46, %v376_v47  ;;  %v49_v44 = vld [vmem:[%s4580_s1 + $0xb0] sm:$0xff]  ;;  %v46_v45 = vld [vmem:[%s4580_s1 + $0x98] sm:$0xff] }
  0x92   :  { %2462 = vmatpush1.bf16.msra.mxu0 %v3168_v51  ;;  %v3235_v51 = vcombine.high %v372_v46, %v376_v47  ;;  %v50_v46 = vld [vmem:[%s4580_s1 + $0xb8] sm:$0xff] }
  0x93   :  { %2585 = vmatpush1.bf16.msra.mxu1 %v3170_v52  ;;  %2463 = vmatprep.subr.bf16.mxu0 %v3177_v53  ;;  %v379_v52 = vld [vmem:[%s4580_s1 + $0xb00] sm:$0xff] }
  0x94   :  { %2586 = vmatprep.subr.bf16.mxu1 %v3179_v54  ;;  %v383_v53 = vld [vmem:[%s4580_s1 + $0xb20] sm:$0xff]  ;;  %v380_v54 = vld [vmem:[%s4580_s1 + $0xb08] sm:$0xff] }
  0x95   :  { %v3241_v59 = vcombine.high %v379_v52, %v383_v53  ;;  %v3240_v1 = vcombine.low %v379_v52, %v383_v53  ;;  %v3242_v2 = vcombine.low %v380_v54, %v384_v55  ;;  %v57_v52 = vld [vmem:[%s4580_s1 + $0xf0] sm:$0xff]  ;;  %v54_v53 = vld [vmem:[%s4580_s1 + $0xd8] sm:$0xff] }
  0x96   :  { %2464 = vmatpush1.bf16.msra.mxu0 %v3176_v60  ;;  %v3243_v60 = vcombine.high %v380_v54, %v384_v55  ;;  %v58_v54 = vld [vmem:[%s4580_s1 + $0xf8] sm:$0xff] }
  0x97   :  { %2587 = vmatpush1.bf16.msra.mxu1 %v3178_v61  ;;  %2465 = vmatprep.subr.bf16.mxu0 %v3185_v62  ;;  %v387_v61 = vld [vmem:[%s4580_s1 + $0xb40] sm:$0xff] }
  0x98   :  { %2588 = vmatprep.subr.bf16.mxu1 %v3187_v63  ;;  %v391_v62 = vld [vmem:[%s4580_s1 + $0xb60] sm:$0xff]  ;;  %v388_v63 = vld [vmem:[%s4580_s1 + $0xb48] sm:$0xff] }
  0x99   :  { %v3249_v3 = vcombine.high %v387_v61, %v391_v62  ;;  %v3248_v9 = vcombine.low %v387_v61, %v391_v62  ;;  %v3250_v10 = vcombine.low %v388_v63, %v392_v0  ;;  %v65_v61 = vld [vmem:[%s4580_s1 + $0x130] sm:$0xff]  ;;  %v66_v62 = vld [vmem:[%s4580_s1 + $0x138] sm:$0xff] }
  0x9a   :  { %2466 = vmatpush1.bf16.msra.mxu0 %v3184_v4  ;;  %v3251_v4 = vcombine.high %v388_v63, %v392_v0  ;;  %v2918_v0 = vcombine.low %v54_v53, %v58_v54 }
  0x9b   :  { %2589 = vmatpush1.bf16.msra.mxu1 %v3186_v5  ;;  %2467 = vmatprep.subr.bf16.mxu0 %v3193_v6  ;;  %v395_v5 = vld [vmem:[%s4580_s1 + $0xb80] sm:$0xff] }
  0x9c   :  { %2590 = vmatprep.subr.bf16.mxu1 %v3195_v7  ;;  %v399_v6 = vld [vmem:[%s4580_s1 + $0xba0] sm:$0xff]  ;;  %v396_v7 = vld [vmem:[%s4580_s1 + $0xb88] sm:$0xff] }
  0x9d   :  { %v3257_v11 = vcombine.high %v395_v5, %v399_v6  ;;  %v3256_v18 = vcombine.low %v395_v5, %v399_v6  ;;  %v3258_v19 = vcombine.low %v396_v7, %v400_v8  ;;  %v70_v5 = vld [vmem:[%s4580_s1 + $0x158] sm:$0xff] }
  0x9e   :  { %2468 = vmatpush1.bf16.msra.mxu0 %v3192_v13  ;;  %v3259_v13 = vcombine.high %v396_v7, %v400_v8  ;;  %v74_v6 = vld [vmem:[%s4580_s1 + $0x178] sm:$0xff] }
  0x9f   :  { %2591 = vmatpush1.bf16.msra.mxu1 %v3194_v14  ;;  %2469 = vmatprep.subr.bf16.mxu0 %v3201_v15  ;;  %v403_v14 = vld [vmem:[%s4580_s1 + $0xbc0] sm:$0xff] }
  0xa0   :  { %2592 = vmatprep.subr.bf16.mxu1 %v3203_v16  ;;  %v407_v15 = vld [vmem:[%s4580_s1 + $0xbe0] sm:$0xff]  ;;  %v404_v16 = vld [vmem:[%s4580_s1 + $0xbc8] sm:$0xff] }
  0xa1   :  { %v3265_v20 = vcombine.high %v403_v14, %v407_v15  ;;  %v3264_v28 = vcombine.low %v403_v14, %v407_v15  ;;  %v3266_v30 = vcombine.low %v404_v16, %v408_v17  ;;  %v78_v14 = vld [vmem:[%s4580_s1 + $0x198] sm:$0xff] }
  0xa2   :  { %2470 = vmatpush1.bf16.msra.mxu0 %v3200_v23  ;;  %v3267_v23 = vcombine.high %v404_v16, %v408_v17  ;;  %v82_v15 = vld [vmem:[%s4580_s1 + $0x1b8] sm:$0xff]  ;;  %v2934_v17 = vcombine.low %v70_v5, %v74_v6 }
  0xa3   :  { %2593 = vmatpush1.bf16.msra.mxu1 %v3202_v24  ;;  %2471 = vmatprep.subr.bf16.mxu0 %v3209_v25  ;;  %v29_v24 = vld [vmem:[%s4580_s1 + $0x10] sm:$0xff] }
  0xa4   :  { %2594 = vmatprep.subr.bf16.mxu1 %v3211_v26  ;;  %v33_v25 = vld [vmem:[%s4580_s1 + $0x30] sm:$0xff]  ;;  %v30_v26 = vld [vmem:[%s4580_s1 + $0x18] sm:$0xff] }
  0xa5   :  { %v2892_v39 = vcombine.low %v29_v24, %v33_v25 }
  0xa6   :  { %2472 = vmatpush1.bf16.msra.mxu0 %v3208_v31  ;;  %v2893_v31 = vcombine.high %v29_v24, %v33_v25  ;;  %v86_v24 = vld [vmem:[%s4580_s1 + $0x1d8] sm:$0xff] }
  0xa7   :  { %2595 = vmatpush1.bf16.msra.mxu1 %v3210_v33  ;;  %2473 = vmatprep.subr.bf16.mxu0 %v3217_v34  ;;  %v2895_v33 = vcombine.high %v30_v26, %v34_v27  ;;  %v37_v34 = vld [vmem:[%s4580_s1 + $0x50] sm:$0xff]  ;;  %v90_v25 = vld [vmem:[%s4580_s1 + $0x1f8] sm:$0xff] }
  0xa8   :  { %2596 = vmatprep.subr.bf16.mxu1 %v3219_v35  ;;  %v41_v35 = vld [vmem:[%s4580_s1 + $0x70] sm:$0xff]  ;;  %v2951_v29 = vcombine.high %v86_v24, %v90_v25 }
  0xa9   :  { %v2900_v47 = vcombine.low %v37_v34, %v41_v35 }
  0xaa   :  { %2474 = vmatpush1.bf16.msra.mxu0 %v3216_v40  ;;  %v2894_v40 = vcombine.low %v30_v26, %v34_v27  ;;  %v2942_v27 = vcombine.low %v78_v14, %v82_v15 }
  0xab   :  { %2597 = vmatpush1.bf16.msra.mxu1 %v3218_v41  ;;  %2475 = vmatprep.subr.bf16.mxu0 %v3225_v42  ;;  %v2901_v41 = vcombine.high %v37_v34, %v41_v35  ;;  %v2903_v42 = vcombine.high %v38_v37, %v42_v38  ;;  %v98_v34 = vld [vmem:[%s4580_s1 + $0x238] sm:$0xff] }
  0xac   :  { %2598 = vmatprep.subr.bf16.mxu1 %v3227_v43  ;;  %v45_v43 = vld [vmem:[%s4580_s1 + $0x90] sm:$0xff] }
  0xad   :  { %v2908_v55 = vcombine.low %v45_v43, %v49_v44 }
  0xae   :  { %2476 = vmatpush1.bf16.msra.mxu0 %v3224_v48  ;;  %v2902_v48 = vcombine.low %v38_v37, %v42_v38  ;;  %v2950_v37 = vcombine.low %v86_v24, %v90_v25 }
  0xaf   :  { %2599 = vmatpush1.bf16.msra.mxu1 %v3226_v49  ;;  %2477 = vmatprep.subr.bf16.mxu0 %v3233_v50  ;;  %v2909_v49 = vcombine.high %v45_v43, %v49_v44  ;;  %v2911_v50 = vcombine.high %v46_v45, %v50_v46  ;;  %v106_v43 = vld [vmem:[%s4580_s1 + $0x278] sm:$0xff] }
  0xb0   :  { %2600 = vmatprep.subr.bf16.mxu1 %v3235_v51  ;;  %v53_v51 = vld [vmem:[%s4580_s1 + $0xd0] sm:$0xff] }
  0xb1   :  { %v2916_v63 = vcombine.low %v53_v51, %v57_v52 }
  0xb2   :  { %2478 = vmatpush1.bf16.msra.mxu0 %v3232_v56  ;;  %v2910_v56 = vcombine.low %v46_v45, %v50_v46 }
  0xb3   :  { %2601 = vmatpush1.bf16.msra.mxu1 %v3234_v58  ;;  %2479 = vmatprep.subr.bf16.mxu0 %v3241_v59  ;;  %v2917_v58 = vcombine.high %v53_v51, %v57_v52  ;;  %v2919_v59 = vcombine.high %v54_v53, %v58_v54  ;;  %v114_v51 = vld [vmem:[%s4580_s1 + $0x2b8] sm:$0xff] }
  0xb4   :  { %2602 = vmatprep.subr.bf16.mxu1 %v3243_v60  ;;  %v61_v60 = vld [vmem:[%s4580_s1 + $0x110] sm:$0xff] }
  0xb5   :  { %v2924_v7 = vcombine.low %v61_v60, %v65_v61 }
  0xb6   :  { %2480 = vmatpush1.bf16.msra.mxu0 %v3240_v1  ;;  %v2925_v1 = vcombine.high %v61_v60, %v65_v61  ;;  %v122_v60 = vld [vmem:[%s4580_s1 + $0x2f8] sm:$0xff] }
  0xb7   :  { %2603 = vmatpush1.bf16.msra.mxu1 %v3242_v2  ;;  %2481 = vmatprep.subr.bf16.mxu0 %v3249_v3  ;;  %v69_v3 = vld [vmem:[%s4580_s1 + $0x150] sm:$0xff] }
  0xb8   :  { %2604 = vmatprep.subr.bf16.mxu1 %v3251_v4  ;;  %v73_v4 = vld [vmem:[%s4580_s1 + $0x170] sm:$0xff] }
  0xb9   :  { %v2932_v16 = vcombine.low %v69_v3, %v73_v4 }
  0xba   :  { %2482 = vmatpush1.bf16.msra.mxu0 %v3248_v9  ;;  %v2933_v9 = vcombine.high %v69_v3, %v73_v4  ;;  %v130_v3 = vld [vmem:[%s4580_s1 + $0x338] sm:$0xff] }
  0xbb   :  { %2605 = vmatpush1.bf16.msra.mxu1 %v3250_v10  ;;  %2483 = vmatprep.subr.bf16.mxu0 %v3257_v11  ;;  %v2935_v10 = vcombine.high %v70_v5, %v74_v6  ;;  %v77_v11 = vld [vmem:[%s4580_s1 + $0x190] sm:$0xff] }
  0xbc   :  { %2606 = vmatprep.subr.bf16.mxu1 %v3259_v13  ;;  %v81_v13 = vld [vmem:[%s4580_s1 + $0x1b0] sm:$0xff] }
  0xbd   :  { %v2940_v26 = vcombine.low %v77_v11, %v81_v13 }
  0xbe   :  { %2484 = vmatpush1.bf16.msra.mxu0 %v3256_v18  ;;  %v2941_v18 = vcombine.high %v77_v11, %v81_v13  ;;  %v138_v11 = vld [vmem:[%s4580_s1 + $0x378] sm:$0xff] }
  0xbf   :  { %2607 = vmatpush1.bf16.msra.mxu1 %v3258_v19  ;;  %2485 = vmatprep.subr.bf16.mxu0 %v3265_v20  ;;  %v2943_v19 = vcombine.high %v78_v14, %v82_v15  ;;  %v85_v20 = vld [vmem:[%s4580_s1 + $0x1d0] sm:$0xff] }
  0xc0   :  { %2608 = vmatprep.subr.bf16.mxu1 %v3267_v23  ;;  %v89_v23 = vld [vmem:[%s4580_s1 + $0x1f0] sm:$0xff] }
  0xc1   :  { %v2948_v35 = vcombine.low %v85_v20, %v89_v23 }
  0xc2   :  { %2486 = vmatpush1.bf16.msra.mxu0 %v3264_v28  ;;  %v2949_v28 = vcombine.high %v85_v20, %v89_v23  ;;  %v146_v20 = vld [vmem:[%s4580_s1 + $0x3b8] sm:$0xff] }
  0xc3   :  { %2609 = vmatpush1.bf16.msra.mxu1 %v3266_v30  ;;  %2619 = vmatprep.subr.bf16.mxu0 %v2893_v31  ;;  %v93_v30 = vld [vmem:[%s4580_s1 + $0x210] sm:$0xff] }
  0xc4   :  { %2742 = vmatprep.subr.bf16.mxu1 %v2895_v33  ;;  %v97_v31 = vld [vmem:[%s4580_s1 + $0x230] sm:$0xff]  ;;  %v94_v33 = vld [vmem:[%s4580_s1 + $0x218] sm:$0xff] }
  0xc5   :  { %2488 = vmatmul.mubr.bf16.vlgmr.msra.gmra.mrb[0].mxu0 %v3990_v36  ;;  %v2957_v38 = vcombine.high %v93_v30, %v97_v31  ;;  %v2956_v44 = vcombine.low %v93_v30, %v97_v31  ;;  %v2958_v45 = vcombine.low %v94_v33, %v98_v34  ;;  %v154_v30 = vld [vmem:[%s4580_s1 + $0x3f8] sm:$0xff] }
  0xc6   :  { %2611 = vmatmul.mubr.bf16.vlgmr.msra.gmra.mrb[0].mxu1 %v3990_v36  ;;  %2620 = vmatpush1.bf16.msra.mxu0 %v2892_v39  ;;  %v2959_v39 = vcombine.high %v94_v33, %v98_v34 }
  0xc7   :  { %2743 = vmatpush1.bf16.msra.mxu1 %v2894_v40  ;;  %2621 = vmatprep.subr.bf16.mxu0 %v2901_v41  ;;  %v101_v40 = vld [vmem:[%s4580_s1 + $0x250] sm:$0xff] }
  0xc8   :  { %2744 = vmatprep.subr.bf16.mxu1 %v2903_v42  ;;  %2651 = vmatprep.mubr.bf16.mxu0 %v3451_v57  ;;  %v105_v41 = vld [vmem:[%s4580_s1 + $0x270] sm:$0xff]  ;;  %v102_v42 = vld [vmem:[%s4580_s1 + $0x258] sm:$0xff] }
  0xc9   :  { %2774 = vmatprep.mubr.bf16.mxu1 %v3451_v57  ;;  %v62_v57 = vld [vmem:[%s4580_s1 + $0x118] sm:$0xff]  ;;  %v2965_v46 = vcombine.high %v101_v40, %v105_v41  ;;  %v2964_v52 = vcombine.low %v101_v40, %v105_v41  ;;  %v2966_v53 = vcombine.low %v102_v42, %v106_v43 }
  0xca   :  { %2622 = vmatpush1.bf16.msra.mxu0 %v2900_v47  ;;  %v2927_v2 = vcombine.high %v62_v57, %v66_v62  ;;  %v2926_v8 = vcombine.low %v62_v57, %v66_v62  ;;  %v2967_v47 = vcombine.high %v102_v42, %v106_v43  ;;  %v162_v40 = vld [vmem:[%s4580_s1 + $0x438] sm:$0xff] }
  0xcb   :  { %2745 = vmatpush1.bf16.msra.mxu1 %v2902_v48  ;;  %2623 = vmatprep.subr.bf16.mxu0 %v2909_v49  ;;  %v109_v48 = vld [vmem:[%s4580_s1 + $0x290] sm:$0xff] }
  0xcc   :  { %2746 = vmatprep.subr.bf16.mxu1 %v2911_v50  ;;  %v113_v49 = vld [vmem:[%s4580_s1 + $0x2b0] sm:$0xff]  ;;  %v110_v50 = vld [vmem:[%s4580_s1 + $0x298] sm:$0xff] }
  0xcd   :  { %v2973_v54 = vcombine.high %v109_v48, %v113_v49  ;;  %v2972_v61 = vcombine.low %v109_v48, %v113_v49  ;;  %v2974_v57 = vcombine.low %v110_v50, %v114_v51  ;;  %v170_v48 = vld [vmem:[%s4580_s1 + $0x478] sm:$0xff] }
  0xce   :  { %2624 = vmatpush1.bf16.msra.mxu0 %v2908_v55  ;;  %v2975_v55 = vcombine.high %v110_v50, %v114_v51 }
  0xcf   :  { %2747 = vmatpush1.bf16.msra.mxu1 %v2910_v56  ;;  %2625 = vmatprep.subr.bf16.mxu0 %v2917_v58  ;;  %v117_v56 = vld [vmem:[%s4580_s1 + $0x2d0] sm:$0xff] }
  0xd0   :  { %2748 = vmatprep.subr.bf16.mxu1 %v2919_v59  ;;  %v121_v58 = vld [vmem:[%s4580_s1 + $0x2f0] sm:$0xff]  ;;  %v118_v59 = vld [vmem:[%s4580_s1 + $0x2d8] sm:$0xff] }
  0xd1   :  { %v2981_v62 = vcombine.high %v117_v56, %v121_v58  ;;  %v2980_v4 = vcombine.low %v117_v56, %v121_v58  ;;  %v2982_v5 = vcombine.low %v118_v59, %v122_v60  ;;  %v178_v56 = vld [vmem:[%s4580_s1 + $0x4b8] sm:$0xff] }
  0xd2   :  { %2626 = vmatpush1.bf16.msra.mxu0 %v2916_v63  ;;  %v2983_v63 = vcombine.high %v118_v59, %v122_v60 }
  0xd3   :  { %2749 = vmatpush1.bf16.msra.mxu1 %v2918_v0  ;;  %2627 = vmatprep.subr.bf16.mxu0 %v2925_v1  ;;  %v125_v0 = vld [vmem:[%s4580_s1 + $0x310] sm:$0xff] }
  0xd4   :  { %2750 = vmatprep.subr.bf16.mxu1 %v2927_v2  ;;  %v129_v1 = vld [vmem:[%s4580_s1 + $0x330] sm:$0xff]  ;;  %v126_v2 = vld [vmem:[%s4580_s1 + $0x318] sm:$0xff] }
  0xd5   :  { %v2989_v6 = vcombine.high %v125_v0, %v129_v1  ;;  %v2988_v13 = vcombine.low %v125_v0, %v129_v1  ;;  %v2990_v14 = vcombine.low %v126_v2, %v130_v3 }
  0xd6   :  { %2628 = vmatpush1.bf16.msra.mxu0 %v2924_v7  ;;  %v2991_v7 = vcombine.high %v126_v2, %v130_v3 }
  0xd7   :  { %2751 = vmatpush1.bf16.msra.mxu1 %v2926_v8  ;;  %2629 = vmatprep.subr.bf16.mxu0 %v2933_v9  ;;  %v133_v8 = vld [vmem:[%s4580_s1 + $0x350] sm:$0xff] }
  0xd8   :  { %2752 = vmatprep.subr.bf16.mxu1 %v2935_v10  ;;  %v137_v9 = vld [vmem:[%s4580_s1 + $0x370] sm:$0xff]  ;;  %v134_v10 = vld [vmem:[%s4580_s1 + $0x358] sm:$0xff] }
  0xd9   :  { %v2997_v15 = vcombine.high %v133_v8, %v137_v9  ;;  %v2996_v23 = vcombine.low %v133_v8, %v137_v9  ;;  %v2998_v24 = vcombine.low %v134_v10, %v138_v11 }
  0xda   :  { %2630 = vmatpush1.bf16.msra.mxu0 %v2932_v16  ;;  %v2999_v16 = vcombine.high %v134_v10, %v138_v11  ;;  %v197_v11 = vld [vmem:[%s4580_s1 + $0x550] sm:$0xff] }
  0xdb   :  { %2753 = vmatpush1.bf16.msra.mxu1 %v2934_v17  ;;  %2631 = vmatprep.subr.bf16.mxu0 %v2941_v18  ;;  %v141_v17 = vld [vmem:[%s4580_s1 + $0x390] sm:$0xff] }
  0xdc   :  { %2754 = vmatprep.subr.bf16.mxu1 %v2943_v19  ;;  %v145_v18 = vld [vmem:[%s4580_s1 + $0x3b0] sm:$0xff]  ;;  %v142_v19 = vld [vmem:[%s4580_s1 + $0x398] sm:$0xff] }
  0xdd   :  { %v3005_v25 = vcombine.high %v141_v17, %v145_v18  ;;  %v3004_v31 = vcombine.low %v141_v17, %v145_v18  ;;  %v3006_v33 = vcombine.low %v142_v19, %v146_v20 }
  0xde   :  { %2632 = vmatpush1.bf16.msra.mxu0 %v2940_v26  ;;  %v3007_v26 = vcombine.high %v142_v19, %v146_v20  ;;  %v205_v20 = vld [vmem:[%s4580_s1 + $0x590] sm:$0xff] }
  0xdf   :  { %2755 = vmatpush1.bf16.msra.mxu1 %v2942_v27  ;;  %2633 = vmatprep.subr.bf16.mxu0 %v2949_v28  ;;  %v149_v27 = vld [vmem:[%s4580_s1 + $0x3d0] sm:$0xff] }
  0xe0   :  { %2756 = vmatprep.subr.bf16.mxu1 %v2951_v29  ;;  %v153_v28 = vld [vmem:[%s4580_s1 + $0x3f0] sm:$0xff]  ;;  %v150_v29 = vld [vmem:[%s4580_s1 + $0x3d8] sm:$0xff] }
  0xe1   :  { %v3013_v34 = vcombine.high %v149_v27, %v153_v28  ;;  %v3012_v41 = vcombine.low %v149_v27, %v153_v28  ;;  %v3014_v42 = vcombine.low %v150_v29, %v154_v30 }
  0xe2   :  { %2634 = vmatpush1.bf16.msra.mxu0 %v2948_v35  ;;  %v3015_v35 = vcombine.high %v150_v29, %v154_v30  ;;  %v213_v30 = vld [vmem:[%s4580_s1 + $0x5d0] sm:$0xff] }
  0xe3   :  { %2757 = vmatpush1.bf16.msra.mxu1 %v2950_v37  ;;  %2635 = vmatprep.subr.bf16.mxu0 %v2957_v38  ;;  %v157_v37 = vld [vmem:[%s4580_s1 + $0x410] sm:$0xff] }
  0xe4   :  { %2758 = vmatprep.subr.bf16.mxu1 %v2959_v39  ;;  %v161_v38 = vld [vmem:[%s4580_s1 + $0x430] sm:$0xff]  ;;  %v158_v39 = vld [vmem:[%s4580_s1 + $0x418] sm:$0xff] }
  0xe5   :  { %v3021_v43 = vcombine.high %v157_v37, %v161_v38  ;;  %v3020_v49 = vcombine.low %v157_v37, %v161_v38  ;;  %v3022_v50 = vcombine.low %v158_v39, %v162_v40 }
  0xe6   :  { %2636 = vmatpush1.bf16.msra.mxu0 %v2956_v44  ;;  %v3023_v44 = vcombine.high %v158_v39, %v162_v40  ;;  %v221_v40 = vld [vmem:[%s4580_s1 + $0x610] sm:$0xff] }
  0xe7   :  { %2759 = vmatpush1.bf16.msra.mxu1 %v2958_v45  ;;  %2637 = vmatprep.subr.bf16.mxu0 %v2965_v46  ;;  %v165_v45 = vld [vmem:[%s4580_s1 + $0x450] sm:$0xff] }
  0xe8   :  { %2760 = vmatprep.subr.bf16.mxu1 %v2967_v47  ;;  %v169_v46 = vld [vmem:[%s4580_s1 + $0x470] sm:$0xff]  ;;  %v166_v47 = vld [vmem:[%s4580_s1 + $0x458] sm:$0xff] }
  0xe9   :  { %v3029_v51 = vcombine.high %v165_v45, %v169_v46  ;;  %v3028_v58 = vcombine.low %v165_v45, %v169_v46  ;;  %v3030_v59 = vcombine.low %v166_v47, %v170_v48 }
  0xea   :  { %2638 = vmatpush1.bf16.msra.mxu0 %v2964_v52  ;;  %v3031_v52 = vcombine.high %v166_v47, %v170_v48  ;;  %v229_v48 = vld [vmem:[%s4580_s1 + $0x650] sm:$0xff] }
  0xeb   :  { %2761 = vmatpush1.bf16.msra.mxu1 %v2966_v53  ;;  %2639 = vmatprep.subr.bf16.mxu0 %v2973_v54  ;;  %v173_v53 = vld [vmem:[%s4580_s1 + $0x490] sm:$0xff] }
  0xec   :  { %2762 = vmatprep.subr.bf16.mxu1 %v2975_v55  ;;  %v177_v54 = vld [vmem:[%s4580_s1 + $0x4b0] sm:$0xff]  ;;  %v174_v55 = vld [vmem:[%s4580_s1 + $0x498] sm:$0xff] }
  0xed   :  { %v3037_v60 = vcombine.high %v173_v53, %v177_v54  ;;  %v3036_v0 = vcombine.low %v173_v53, %v177_v54  ;;  %v3038_v1 = vcombine.low %v174_v55, %v178_v56 }
  0xee   :  { %2640 = vmatpush1.bf16.msra.mxu0 %v2972_v61  ;;  %v3039_v61 = vcombine.high %v174_v55, %v178_v56  ;;  %v237_v56 = vld [vmem:[%s4580_s1 + $0x690] sm:$0xff] }
  0xef   :  { %2763 = vmatpush1.bf16.msra.mxu1 %v2974_v57  ;;  %2641 = vmatprep.subr.bf16.mxu0 %v2981_v62  ;;  %v181_v57 = vld [vmem:[%s4580_s1 + $0x4d0] sm:$0xff] }
  0xf0   :  { %2764 = vmatprep.subr.bf16.mxu1 %v2983_v63  ;;  %v185_v62 = vld [vmem:[%s4580_s1 + $0x4f0] sm:$0xff]  ;;  %v186_v63 = vld [vmem:[%s4580_s1 + $0x4f8] sm:$0xff] }
  0xf1   :  { %v3045_v2 = vcombine.high %v181_v57, %v185_v62 }
  0xf2   :  { %2642 = vmatpush1.bf16.msra.mxu0 %v2980_v4  ;;  %v189_v4 = vld [vmem:[%s4580_s1 + $0x510] sm:$0xff] }
  0xf3   :  { %2765 = vmatpush1.bf16.msra.mxu1 %v2982_v5  ;;  %2643 = vmatprep.subr.bf16.mxu0 %v2989_v6  ;;  %v193_v5 = vld [vmem:[%s4580_s1 + $0x530] sm:$0xff]  ;;  %v194_v6 = vld [vmem:[%s4580_s1 + $0x538] sm:$0xff] }
  0xf4   :  { %2766 = vmatprep.subr.bf16.mxu1 %v2991_v7  ;;  %v3044_v7 = vcombine.low %v181_v57, %v185_v62  ;;  %v3053_v9 = vcombine.high %v189_v4, %v193_v5 }
  0xf6   :  { %2644 = vmatpush1.bf16.msra.mxu0 %v2988_v13  ;;  %v201_v13 = vld [vmem:[%s4580_s1 + $0x570] sm:$0xff] }
  0xf7   :  { %2767 = vmatpush1.bf16.msra.mxu1 %v2990_v14  ;;  %2645 = vmatprep.subr.bf16.mxu0 %v2997_v15  ;;  %v198_v14 = vld [vmem:[%s4580_s1 + $0x558] sm:$0xff]  ;;  %v3061_v18 = vcombine.high %v197_v11, %v201_v13 }
  0xf8   :  { %2768 = vmatprep.subr.bf16.mxu1 %v2999_v16  ;;  %v202_v15 = vld [vmem:[%s4580_s1 + $0x578] sm:$0xff]  ;;  %v3052_v16 = vcombine.low %v189_v4, %v193_v5 }
  0xf9   :  { %v3063_v19 = vcombine.high %v198_v14, %v202_v15  ;;  %v3062_v27 = vcombine.low %v198_v14, %v202_v15  ;;  %v261_v15 = vld [vmem:[%s4580_s1 + $0x750] sm:$0xff] }
  0xfa   :  { %2646 = vmatpush1.bf16.msra.mxu0 %v2996_v23  ;;  %v209_v23 = vld [vmem:[%s4580_s1 + $0x5b0] sm:$0xff] }
  0xfb   :  { %2769 = vmatpush1.bf16.msra.mxu1 %v2998_v24  ;;  %2647 = vmatprep.subr.bf16.mxu0 %v3005_v25  ;;  %v206_v24 = vld [vmem:[%s4580_s1 + $0x598] sm:$0xff]  ;;  %v3069_v28 = vcombine.high %v205_v20, %v209_v23 }
  0xfc   :  { %2770 = vmatprep.subr.bf16.mxu1 %v3007_v26  ;;  %v210_v25 = vld [vmem:[%s4580_s1 + $0x5b8] sm:$0xff]  ;;  %v3060_v26 = vcombine.low %v197_v11, %v201_v13 }
  0xfd   :  { %v3071_v29 = vcombine.high %v206_v24, %v210_v25  ;;  %v3070_v37 = vcombine.low %v206_v24, %v210_v25  ;;  %v269_v25 = vld [vmem:[%s4580_s1 + $0x790] sm:$0xff] }
  0xfe   :  { %2648 = vmatpush1.bf16.msra.mxu0 %v3004_v31  ;;  %v217_v31 = vld [vmem:[%s4580_s1 + $0x5f0] sm:$0xff] }
  0xff   :  { %2771 = vmatpush1.bf16.msra.mxu1 %v3006_v33  ;;  %2649 = vmatprep.subr.bf16.mxu0 %v3013_v34  ;;  %v214_v33 = vld [vmem:[%s4580_s1 + $0x5d8] sm:$0xff]  ;;  %v3077_v38 = vcombine.high %v213_v30, %v217_v31 }
 0x100   :  { %2772 = vmatprep.subr.bf16.mxu1 %v3015_v35  ;;  %v218_v34 = vld [vmem:[%s4580_s1 + $0x5f8] sm:$0xff]  ;;  %v3068_v35 = vcombine.low %v205_v20, %v209_v23 }
 0x101   :  { %v3079_v39 = vcombine.high %v214_v33, %v218_v34  ;;  %v3078_v45 = vcombine.low %v214_v33, %v218_v34  ;;  %v277_v34 = vld [vmem:[%s4580_s1 + $0x7d0] sm:$0xff] }
 0x102   :  { %2650 = vmatpush1.bf16.msra.mxu0 %v3012_v41  ;;  %v225_v41 = vld [vmem:[%s4580_s1 + $0x630] sm:$0xff] }
 0x103   :  { %2773 = vmatpush1.bf16.msra.mxu1 %v3014_v42  ;;  %2660 = vmatprep.subr.bf16.mxu0 %v3021_v43  ;;  %v222_v42 = vld [vmem:[%s4580_s1 + $0x618] sm:$0xff]  ;;  %v3085_v46 = vcombine.high %v221_v40, %v225_v41 }
 0x104   :  { %2783 = vmatprep.subr.bf16.mxu1 %v3023_v44  ;;  %v226_v43 = vld [vmem:[%s4580_s1 + $0x638] sm:$0xff]  ;;  %v3076_v44 = vcombine.low %v213_v30, %v217_v31 }
 0x105   :  { %2652 = vmatmul.mubr.bf16.vlgmr.msra.gmra.mrb[4].mxu0 %v3578_v12  ;;  %v3087_v47 = vcombine.high %v222_v42, %v226_v43  ;;  %v3086_v53 = vcombine.low %v222_v42, %v226_v43  ;;  %v285_v43 = vld [vmem:[%s4580_s1 + $0x810] sm:$0xff] }
 0x106   :  { %2661 = vmatpush1.bf16.msra.mxu0 %v3020_v49  ;;  %2775 = vmatmul.mubr.bf16.vlgmr.msra.gmra.mrb[4].mxu1 %v3578_v12  ;;  %v182_v12 = vld [vmem:[%s4580_s1 + $0x4d8] sm:$0xff]  ;;  %v233_v49 = vld [vmem:[%s4580_s1 + $0x670] sm:$0xff] }
 0x107   :  { %2784 = vmatpush1.bf16.msra.mxu1 %v3022_v50  ;;  %2662 = vmatprep.subr.bf16.mxu0 %v3029_v51  ;;  %v3047_v3 = vcombine.high %v182_v12, %v186_v63  ;;  %v3046_v8 = vcombine.low %v182_v12, %v186_v63  ;;  %v230_v50 = vld [vmem:[%s4580_s1 + $0x658] sm:$0xff]  ;;  %v3093_v54 = vcombine.high %v229_v48, %v233_v49  ;;  %v245_v63 = vld [vmem:[%s4580_s1 + $0x6d0] sm:$0xff] }
 0x108   :  { %2785 = vmatprep.subr.bf16.mxu1 %v3031_v52  ;;  %2692 = vmatprep.mubr.bf16.mxu0 %v3595_v22  ;;  %v234_v51 = vld [vmem:[%s4580_s1 + $0x678] sm:$0xff]  ;;  %v3084_v52 = vcombine.low %v221_v40, %v225_v41 }
 0x109   :  { %2815 = vmatprep.mubr.bf16.mxu1 %v3595_v22  ;;  %v190_v22 = vld [vmem:[%s4580_s1 + $0x518] sm:$0xff]  ;;  %v3095_v55 = vcombine.high %v230_v50, %v234_v51  ;;  %v3094_v57 = vcombine.low %v230_v50, %v234_v51  ;;  %v293_v51 = vld [vmem:[%s4580_s1 + $0x850] sm:$0xff] }
 0x10a   :  { %2663 = vmatpush1.bf16.msra.mxu0 %v3028_v58  ;;  %v3055_v10 = vcombine.high %v190_v22, %v194_v6  ;;  %v3054_v17 = vcombine.low %v190_v22, %v194_v6  ;;  %v241_v58 = vld [vmem:[%s4580_s1 + $0x6b0] sm:$0xff] }
 0x10b   :  { %2786 = vmatpush1.bf16.msra.mxu1 %v3030_v59  ;;  %2664 = vmatprep.subr.bf16.mxu0 %v3037_v60  ;;  %v238_v59 = vld [vmem:[%s4580_s1 + $0x698] sm:$0xff]  ;;  %v3101_v62 = vcombine.high %v237_v56, %v241_v58  ;;  %v253_v6 = vld [vmem:[%s4580_s1 + $0x710] sm:$0xff] }
 0x10c   :  { %2787 = vmatprep.subr.bf16.mxu1 %v3039_v61  ;;  %v242_v60 = vld [vmem:[%s4580_s1 + $0x6b8] sm:$0xff]  ;;  %v3092_v61 = vcombine.low %v229_v48, %v233_v49 }
 0x10d   :  { %v3103_v12 = vcombine.high %v238_v59, %v242_v60  ;;  %v3102_v4 = vcombine.low %v238_v59, %v242_v60  ;;  %v301_v60 = vld [vmem:[%s4580_s1 + $0x890] sm:$0xff] }
 0x10e   :  { %2665 = vmatpush1.bf16.msra.mxu0 %v3036_v0  ;;  %v249_v0 = vld [vmem:[%s4580_s1 + $0x6f0] sm:$0xff] }
 0x10f   :  { %2788 = vmatpush1.bf16.msra.mxu1 %v3038_v1  ;;  %2666 = vmatprep.subr.bf16.mxu0 %v3045_v2  ;;  %v246_v1 = vld [vmem:[%s4580_s1 + $0x6d8] sm:$0xff]  ;;  %v3109_v5 = vcombine.high %v245_v63, %v249_v0 }
 0x110   :  { %2789 = vmatprep.subr.bf16.mxu1 %v3047_v3  ;;  %v250_v2 = vld [vmem:[%s4580_s1 + $0x6f8] sm:$0xff]  ;;  %v3100_v3 = vcombine.low %v237_v56, %v241_v58 }
 0x111   :  { %v3111_v22 = vcombine.high %v246_v1, %v250_v2  ;;  %v3110_v11 = vcombine.low %v246_v1, %v250_v2  ;;  %v309_v2 = vld [vmem:[%s4580_s1 + $0x8d0] sm:$0xff] }
 0x112   :  { %2667 = vmatpush1.bf16.msra.mxu0 %v3044_v7  ;;  %v257_v7 = vld [vmem:[%s4580_s1 + $0x730] sm:$0xff] }
 0x113   :  { %2790 = vmatpush1.bf16.msra.mxu1 %v3046_v8  ;;  %2668 = vmatprep.subr.bf16.mxu0 %v3053_v9  ;;  %v254_v8 = vld [vmem:[%s4580_s1 + $0x718] sm:$0xff]  ;;  %v3117_v13 = vcombine.high %v253_v6, %v257_v7 }
 0x114   :  { %2791 = vmatprep.subr.bf16.mxu1 %v3055_v10  ;;  %v258_v9 = vld [vmem:[%s4580_s1 + $0x738] sm:$0xff]  ;;  %v3108_v10 = vcombine.low %v245_v63, %v249_v0 }
 0x115   :  { %v3119_v14 = vcombine.high %v254_v8, %v258_v9  ;;  %v3118_v20 = vcombine.low %v254_v8, %v258_v9  ;;  %v317_v8 = vld [vmem:[%s4580_s1 + $0x910] sm:$0xff] }
 0x116   :  { %2669 = vmatpush1.bf16.msra.mxu0 %v3052_v16  ;;  %v265_v16 = vld [vmem:[%s4580_s1 + $0x770] sm:$0xff] }
 0x117   :  { %2792 = vmatpush1.bf16.msra.mxu1 %v3054_v17  ;;  %2670 = vmatprep.subr.bf16.mxu0 %v3061_v18  ;;  %v262_v17 = vld [vmem:[%s4580_s1 + $0x758] sm:$0xff]  ;;  %v3125_v23 = vcombine.high %v261_v15, %v265_v16  ;;  %v321_v9 = vld [vmem:[%s4580_s1 + $0x930] sm:$0xff] }
 0x118   :  { %2793 = vmatprep.subr.bf16.mxu1 %v3063_v19  ;;  %v266_v18 = vld [vmem:[%s4580_s1 + $0x778] sm:$0xff]  ;;  %v3116_v19 = vcombine.low %v253_v6, %v257_v7 }
 0x119   :  { %v3127_v24 = vcombine.high %v262_v17, %v266_v18  ;;  %v3126_v30 = vcombine.low %v262_v17, %v266_v18  ;;  %v329_v17 = vld [vmem:[%s4580_s1 + $0x970] sm:$0xff]  ;;  %v326_v18 = vld [vmem:[%s4580_s1 + $0x958] sm:$0xff] }
 0x11a   :  { %2671 = vmatpush1.bf16.msra.mxu0 %v3060_v26  ;;  %v273_v26 = vld [vmem:[%s4580_s1 + $0x7b0] sm:$0xff] }
 0x11b   :  { %2794 = vmatpush1.bf16.msra.mxu1 %v3062_v27  ;;  %2672 = vmatprep.subr.bf16.mxu0 %v3069_v28  ;;  %v270_v27 = vld [vmem:[%s4580_s1 + $0x798] sm:$0xff]  ;;  %v3133_v31 = vcombine.high %v269_v25, %v273_v26 }
 0x11c   :  { %2795 = vmatprep.subr.bf16.mxu1 %v3071_v29  ;;  %v274_v28 = vld [vmem:[%s4580_s1 + $0x7b8] sm:$0xff]  ;;  %v3124_v29 = vcombine.low %v261_v15, %v265_v16  ;;  %v325_v16 = vld [vmem:[%s4580_s1 + $0x950] sm:$0xff] }
 0x11d   :  { %v3135_v33 = vcombine.high %v270_v27, %v274_v28  ;;  %v3134_v40 = vcombine.low %v270_v27, %v274_v28  ;;  %v337_v27 = vld [vmem:[%s4580_s1 + $0x9b0] sm:$0xff]  ;;  %v334_v28 = vld [vmem:[%s4580_s1 + $0x998] sm:$0xff] }
 0x11e   :  { %2673 = vmatpush1.bf16.msra.mxu0 %v3068_v35  ;;  %v281_v35 = vld [vmem:[%s4580_s1 + $0x7f0] sm:$0xff] }
 0x11f   :  { %2796 = vmatpush1.bf16.msra.mxu1 %v3070_v37  ;;  %2674 = vmatprep.subr.bf16.mxu0 %v3077_v38  ;;  %v278_v37 = vld [vmem:[%s4580_s1 + $0x7d8] sm:$0xff]  ;;  %v3141_v41 = vcombine.high %v277_v34, %v281_v35 }
 0x120   :  { %2797 = vmatprep.subr.bf16.mxu1 %v3079_v39  ;;  %v282_v38 = vld [vmem:[%s4580_s1 + $0x7f8] sm:$0xff]  ;;  %v3132_v39 = vcombine.low %v269_v25, %v273_v26  ;;  %v333_v26 = vld [vmem:[%s4580_s1 + $0x990] sm:$0xff] }
 0x121   :  { %v3143_v42 = vcombine.high %v278_v37, %v282_v38  ;;  %v3142_v48 = vcombine.low %v278_v37, %v282_v38  ;;  %v345_v37 = vld [vmem:[%s4580_s1 + $0x9f0] sm:$0xff]  ;;  %v342_v38 = vld [vmem:[%s4580_s1 + $0x9d8] sm:$0xff] }
 0x122   :  { %2675 = vmatpush1.bf16.msra.mxu0 %v3076_v44  ;;  %v289_v44 = vld [vmem:[%s4580_s1 + $0x830] sm:$0xff] }
 0x123   :  { %2798 = vmatpush1.bf16.msra.mxu1 %v3078_v45  ;;  %2676 = vmatprep.subr.bf16.mxu0 %v3085_v46  ;;  %v286_v45 = vld [vmem:[%s4580_s1 + $0x818] sm:$0xff]  ;;  %v3149_v49 = vcombine.high %v285_v43, %v289_v44 }
 0x124   :  { %2799 = vmatprep.subr.bf16.mxu1 %v3087_v47  ;;  %v290_v46 = vld [vmem:[%s4580_s1 + $0x838] sm:$0xff]  ;;  %v3140_v47 = vcombine.low %v277_v34, %v281_v35  ;;  %v341_v35 = vld [vmem:[%s4580_s1 + $0x9d0] sm:$0xff] }
 0x125   :  { %v3151_v50 = vcombine.high %v286_v45, %v290_v46  ;;  %v3150_v56 = vcombine.low %v286_v45, %v290_v46  ;;  %v353_v45 = vld [vmem:[%s4580_s1 + $0xa30] sm:$0xff]  ;;  %v350_v46 = vld [vmem:[%s4580_s1 + $0xa18] sm:$0xff] }
 0x126   :  { %2677 = vmatpush1.bf16.msra.mxu0 %v3084_v52  ;;  %v297_v52 = vld [vmem:[%s4580_s1 + $0x870] sm:$0xff] }
 0x127   :  { %2800 = vmatpush1.bf16.msra.mxu1 %v3086_v53  ;;  %2678 = vmatprep.subr.bf16.mxu0 %v3093_v54  ;;  %v294_v53 = vld [vmem:[%s4580_s1 + $0x858] sm:$0xff]  ;;  %v3157_v58 = vcombine.high %v293_v51, %v297_v52 }
 0x128   :  { %2801 = vmatprep.subr.bf16.mxu1 %v3095_v55  ;;  %v298_v54 = vld [vmem:[%s4580_s1 + $0x878] sm:$0xff]  ;;  %v3148_v55 = vcombine.low %v285_v43, %v289_v44  ;;  %v349_v44 = vld [vmem:[%s4580_s1 + $0xa10] sm:$0xff] }
 0x129   :  { %v3159_v59 = vcombine.high %v294_v53, %v298_v54  ;;  %v3158_v63 = vcombine.low %v294_v53, %v298_v54  ;;  %v361_v53 = vld [vmem:[%s4580_s1 + $0xa70] sm:$0xff]  ;;  %v358_v54 = vld [vmem:[%s4580_s1 + $0xa58] sm:$0xff] }
 0x12a   :  { %2679 = vmatpush1.bf16.msra.mxu0 %v3092_v61  ;;  %v305_v61 = vld [vmem:[%s4580_s1 + $0x8b0] sm:$0xff] }
 0x12b   :  { %2802 = vmatpush1.bf16.msra.mxu1 %v3094_v57  ;;  %2680 = vmatprep.subr.bf16.mxu0 %v3101_v62  ;;  %v302_v57 = vld [vmem:[%s4580_s1 + $0x898] sm:$0xff]  ;;  %v3165_v0 = vcombine.high %v301_v60, %v305_v61 }
 0x12c   :  { %2803 = vmatprep.subr.bf16.mxu1 %v3103_v12  ;;  %v306_v62 = vld [vmem:[%s4580_s1 + $0x8b8] sm:$0xff]  ;;  %v3156_v12 = vcombine.low %v293_v51, %v297_v52  ;;  %v357_v52 = vld [vmem:[%s4580_s1 + $0xa50] sm:$0xff] }
 0x12d   :  { %v3167_v1 = vcombine.high %v302_v57, %v306_v62 }
 0x12e   :  { %2681 = vmatpush1.bf16.msra.mxu0 %v3100_v3  ;;  %v313_v3 = vld [vmem:[%s4580_s1 + $0x8f0] sm:$0xff] }
 0x12f   :  { %2804 = vmatpush1.bf16.msra.mxu1 %v3102_v4  ;;  %2682 = vmatprep.subr.bf16.mxu0 %v3109_v5  ;;  %v314_v4 = vld [vmem:[%s4580_s1 + $0x8f8] sm:$0xff]  ;;  %v3164_v5 = vcombine.low %v301_v60, %v305_v61  ;;  %v3173_v6 = vcombine.high %v309_v2, %v313_v3  ;;  %v365_v61 = vld [vmem:[%s4580_s1 + $0xa90] sm:$0xff] }
 0x130   :  { %2805 = vmatprep.subr.bf16.mxu1 %v3111_v22  ;;  %v3166_v22 = vcombine.low %v302_v57, %v306_v62  ;;  %v369_v57 = vld [vmem:[%s4580_s1 + $0xab0] sm:$0xff]  ;;  %v366_v62 = vld [vmem:[%s4580_s1 + $0xa98] sm:$0xff] }
 0x132   :  { %2683 = vmatpush1.bf16.msra.mxu0 %v3108_v10  ;;  %v322_v10 = vld [vmem:[%s4580_s1 + $0x938] sm:$0xff] }
 0x133   :  { %2806 = vmatpush1.bf16.msra.mxu1 %v3110_v11  ;;  %2684 = vmatprep.subr.bf16.mxu0 %v3117_v13  ;;  %v3172_v11 = vcombine.low %v309_v2, %v313_v3  ;;  %v373_v3 = vld [vmem:[%s4580_s1 + $0xad0] sm:$0xff] }
 0x134   :  { %2807 = vmatprep.subr.bf16.mxu1 %v3119_v14  ;;  %v3181_v14 = vcombine.high %v317_v8, %v321_v9 }
 0x136   :  { %2685 = vmatpush1.bf16.msra.mxu0 %v3116_v19  ;;  %v330_v19 = vld [vmem:[%s4580_s1 + $0x978] sm:$0xff] }
 0x137   :  { %2808 = vmatpush1.bf16.msra.mxu1 %v3118_v20  ;;  %2686 = vmatprep.subr.bf16.mxu0 %v3125_v23  ;;  %v3180_v20 = vcombine.low %v317_v8, %v321_v9  ;;  %v3191_v25 = vcombine.high %v326_v18, %v330_v19  ;;  %v381_v9 = vld [vmem:[%s4580_s1 + $0xb10] sm:$0xff] }
 0x138   :  { %2809 = vmatprep.subr.bf16.mxu1 %v3127_v24  ;;  %v3189_v24 = vcombine.high %v325_v16, %v329_v17 }
 0x13a   :  { %2687 = vmatpush1.bf16.msra.mxu0 %v3124_v29  ;;  %v338_v29 = vld [vmem:[%s4580_s1 + $0x9b8] sm:$0xff] }
 0x13b   :  { %2810 = vmatpush1.bf16.msra.mxu1 %v3126_v30  ;;  %2688 = vmatprep.subr.bf16.mxu0 %v3133_v31  ;;  %v3188_v30 = vcombine.low %v325_v16, %v329_v17  ;;  %v3190_v31 = vcombine.low %v326_v18, %v330_v19  ;;  %v3199_v34 = vcombine.high %v334_v28, %v338_v29  ;;  %v389_v17 = vld [vmem:[%s4580_s1 + $0xb50] sm:$0xff]  ;;  %v390_v19 = vld [vmem:[%s4580_s1 + $0xb58] sm:$0xff] }
 0x13c   :  { %2811 = vmatprep.subr.bf16.mxu1 %v3135_v33  ;;  %v3197_v33 = vcombine.high %v333_v26, %v337_v27  ;;  %v393_v18 = vld [vmem:[%s4580_s1 + $0xb70] sm:$0xff] }
 0x13e   :  { %2689 = vmatpush1.bf16.msra.mxu0 %v3132_v39  ;;  %v346_v39 = vld [vmem:[%s4580_s1 + $0x9f8] sm:$0xff] }
 0x13f   :  { %2812 = vmatpush1.bf16.msra.mxu1 %v3134_v40  ;;  %2690 = vmatprep.subr.bf16.mxu0 %v3141_v41  ;;  %v3196_v40 = vcombine.low %v333_v26, %v337_v27  ;;  %v3198_v41 = vcombine.low %v334_v28, %v338_v29  ;;  %v3207_v43 = vcombine.high %v342_v38, %v346_v39  ;;  %v397_v27 = vld [vmem:[%s4580_s1 + $0xb90] sm:$0xff]  ;;  %v398_v29 = vld [vmem:[%s4580_s1 + $0xb98] sm:$0xff] }
 0x140   :  { %2813 = vmatprep.subr.bf16.mxu1 %v3143_v42  ;;  %v3205_v42 = vcombine.high %v341_v35, %v345_v37  ;;  %v401_v28 = vld [vmem:[%s4580_s1 + $0xbb0] sm:$0xff] }
 0x142   :  { %2691 = vmatpush1.bf16.msra.mxu0 %v3140_v47  ;;  %v354_v47 = vld [vmem:[%s4580_s1 + $0xa38] sm:$0xff] }
 0x143   :  { %2814 = vmatpush1.bf16.msra.mxu1 %v3142_v48  ;;  %2701 = vmatprep.subr.bf16.mxu0 %v3149_v49  ;;  %v3204_v48 = vcombine.low %v341_v35, %v345_v37  ;;  %v3206_v49 = vcombine.low %v342_v38, %v346_v39  ;;  %v3215_v51 = vcombine.high %v350_v46, %v354_v47  ;;  %v405_v37 = vld [vmem:[%s4580_s1 + $0xbd0] sm:$0xff]  ;;  %v406_v39 = vld [vmem:[%s4580_s1 + $0xbd8] sm:$0xff] }
 0x144   :  { %2824 = vmatprep.subr.bf16.mxu1 %v3151_v50  ;;  %v3213_v50 = vcombine.high %v349_v44, %v353_v45  ;;  %v409_v38 = vld [vmem:[%s4580_s1 + $0xbf0] sm:$0xff] }
 0x145   :  { %2693 = vmatmul.mubr.bf16.vlgmr.msra.gmra.mrb[4].mxu0 %v3784_v21 }
 0x146   :  { %2702 = vmatpush1.bf16.msra.mxu0 %v3148_v55  ;;  %2816 = vmatmul.mubr.bf16.vlgmr.msra.gmra.mrb[4].mxu1 %v3784_v21  ;;  %v310_v21 = vld [vmem:[%s4580_s1 + $0x8d8] sm:$0xff] }
 0x147   :  { %2825 = vmatpush1.bf16.msra.mxu1 %v3150_v56  ;;  %2703 = vmatprep.subr.bf16.mxu0 %v3157_v58  ;;  %v3175_v7 = vcombine.high %v310_v21, %v314_v4  ;;  %v3174_v13 = vcombine.low %v310_v21, %v314_v4  ;;  %v362_v55 = vld [vmem:[%s4580_s1 + $0xa78] sm:$0xff]  ;;  %v3212_v56 = vcombine.low %v349_v44, %v353_v45  ;;  %v377_v21 = vld [vmem:[%s4580_s1 + $0xaf0] sm:$0xff] }
 0x148   :  { %2826 = vmatprep.subr.bf16.mxu1 %v3159_v59  ;;  %2733 = vmatprep.mubr.bf16.mxu0 %v3801_v32  ;;  %v3214_v58 = vcombine.low %v350_v46, %v354_v47  ;;  %v3221_v59 = vcombine.high %v357_v52, %v361_v53  ;;  %v3223_v60 = vcombine.high %v358_v54, %v362_v55  ;;  %v374_v4 = vld [vmem:[%s4580_s1 + $0xad8] sm:$0xff]  ;;  %v413_v47 = vlaneseq }
 0x149   :  { %2856 = vmatprep.mubr.bf16.mxu1 %v3801_v32  ;;  %v318_v32 = vld [vmem:[%s4580_s1 + $0x918] sm:$0xff]  ;;  %v3268_v45 = vcombine.low %v405_v37, %v409_v38 }
 0x14a   :  { %2704 = vmatpush1.bf16.msra.mxu0 %v3156_v12  ;;  %v3183_v15 = vcombine.high %v318_v32, %v322_v10  ;;  %v3182_v23 = vcombine.low %v318_v32, %v322_v10  ;;  %v370_v12 = vld [vmem:[%s4580_s1 + $0xab8] sm:$0xff]  ;;  %v385_v32 = vld [vmem:[%s4580_s1 + $0xb30] sm:$0xff] }
 0x14b   :  { %2827 = vmatpush1.bf16.msra.mxu1 %v3158_v63  ;;  %2705 = vmatprep.subr.bf16.mxu0 %v3165_v0  ;;  %v3220_v63 = vcombine.low %v357_v52, %v361_v53  ;;  %v3222_v0 = vcombine.low %v358_v54, %v362_v55  ;;  %v3231_v2 = vcombine.high %v366_v62, %v370_v12  ;;  %v382_v10 = vld [vmem:[%s4580_s1 + $0xb18] sm:$0xff] }
 0x14c   :  { %2828 = vmatprep.subr.bf16.mxu1 %v3167_v1  ;;  %v3229_v1 = vcombine.high %v365_v61, %v369_v57 }
 0x14e   :  { %2706 = vmatpush1.bf16.msra.mxu0 %v3164_v5  ;;  %v378_v5 = vld [vmem:[%s4580_s1 + $0xaf8] sm:$0xff] }
 0x14f   :  { %2829 = vmatpush1.bf16.msra.mxu1 %v3166_v22  ;;  %2707 = vmatprep.subr.bf16.mxu0 %v3173_v6  ;;  %v3228_v22 = vcombine.low %v365_v61, %v369_v57  ;;  %v3230_v6 = vcombine.low %v366_v62, %v370_v12  ;;  %v3239_v8 = vcombine.high %v374_v4, %v378_v5 }
 0x150   :  { %2830 = vmatprep.subr.bf16.mxu1 %v3175_v7  ;;  %v3237_v7 = vcombine.high %v373_v3, %v377_v21 }
 0x152   :  { %2708 = vmatpush1.bf16.msra.mxu0 %v3172_v11  ;;  %v386_v11 = vld [vmem:[%s4580_s1 + $0xb38] sm:$0xff] }
 0x153   :  { %2831 = vmatpush1.bf16.msra.mxu1 %v3174_v13  ;;  %2709 = vmatprep.subr.bf16.mxu0 %v3181_v14  ;;  %v3236_v13 = vcombine.low %v373_v3, %v377_v21  ;;  %v3238_v14 = vcombine.low %v374_v4, %v378_v5  ;;  %v3247_v16 = vcombine.high %v382_v10, %v386_v11 }
 0x154   :  { %2832 = vmatprep.subr.bf16.mxu1 %v3183_v15  ;;  %v3245_v15 = vcombine.high %v381_v9, %v385_v32 }
 0x156   :  { %2710 = vmatpush1.bf16.msra.mxu0 %v3180_v20  ;;  %v394_v20 = vld [vmem:[%s4580_s1 + $0xb78] sm:$0xff] }
 0x157   :  { %2833 = vmatpush1.bf16.msra.mxu1 %v3182_v23  ;;  %2711 = vmatprep.subr.bf16.mxu0 %v3189_v24  ;;  %v3244_v23 = vcombine.low %v381_v9, %v385_v32  ;;  %v3246_v24 = vcombine.low %v382_v10, %v386_v11  ;;  %v3255_v26 = vcombine.high %v390_v19, %v394_v20 }
 0x158   :  { %2834 = vmatprep.subr.bf16.mxu1 %v3191_v25  ;;  %v3253_v25 = vcombine.high %v389_v17, %v393_v18 }
 0x15a   :  { %2712 = vmatpush1.bf16.msra.mxu0 %v3188_v30  ;;  %v402_v30 = vld [vmem:[%s4580_s1 + $0xbb8] sm:$0xff] }
 0x15b   :  { %2835 = vmatpush1.bf16.msra.mxu1 %v3190_v31  ;;  %2713 = vmatprep.subr.bf16.mxu0 %v3197_v33  ;;  %v3252_v31 = vcombine.low %v389_v17, %v393_v18  ;;  %v3254_v33 = vcombine.low %v390_v19, %v394_v20  ;;  %v3263_v35 = vcombine.high %v398_v29, %v402_v30 }
 0x15c   :  { %2836 = vmatprep.subr.bf16.mxu1 %v3199_v34  ;;  %v3261_v34 = vcombine.high %v397_v27, %v401_v28 }
 0x15e   :  { %2714 = vmatpush1.bf16.msra.mxu0 %v3196_v40  ;;  %v410_v40 = vld [vmem:[%s4580_s1 + $0xbf8] sm:$0xff] }
 0x15f   :  { %2837 = vmatpush1.bf16.msra.mxu1 %v3198_v41  ;;  %2715 = vmatprep.subr.bf16.mxu0 %v3205_v42  ;;  %v3260_v41 = vcombine.low %v397_v27, %v401_v28  ;;  %v3262_v42 = vcombine.low %v398_v29, %v402_v30  ;;  %v3271_v44 = vcombine.high %v406_v39, %v410_v40 }
 0x160   :  { %2838 = vmatprep.subr.bf16.mxu1 %v3207_v43  ;;  %v3269_v43 = vcombine.high %v405_v37, %v409_v38  ;;  %v3270_v46 = vcombine.low %v406_v39, %v410_v40 }
 0x162   :  { %2716 = vmatpush1.bf16.msra.mxu0 %v3204_v48  ;;  %v414_v48 = vshrl.u32 %v413_v47, 7 }
 0x163   :  { %2839 = vmatpush1.bf16.msra.mxu1 %v3206_v49  ;;  %2717 = vmatprep.subr.bf16.mxu0 %v3213_v50  ;;  %v411_v50 = vld [vmem:[%s4581_s2] sm:$0xff]  ;;  %s3337_s2 = smov [#allocation2]  }
 0x164   :  { %2840 = vmatprep.subr.bf16.mxu1 %v3215_v51  ;;  %v415_v49 = vsub.s32 0, %v414_v48  ;;  %v423_v51 = vsub.s32 2, %v414_v48  ;;  %v419_v52 = vsub.s32 1, %v414_v48  ;;  %v427_v53 = vsub.s32 3, %v414_v48  ;;  %s2880_s23 = sshll.u32 %s3337_s2, 4  ;;  %s2881_s23 = int_to_ptr.vmem [resolvable:$true] %s2880_s23 }
 0x165   :  { %v431_v21 = vsub.s32 4, %v414_v48  ;;  %v439_v4 = vsub.s32 6, %v414_v48  ;;  %v435_v5 = vsub.s32 5, %v414_v48  ;;  %s3313_s24 = scalar_lea.vmem %s2881_s23, 1024  ;;  %p3318_p1 = scmp.lt.s32.totalorder %s2881_s23, %s2881_s23 }
 0x166   :  { %2718 = vmatpush1.bf16.msra.mxu0 %v3212_v56  ;;  %v416_v54 = vrot.slane %v411_v50, %v415_v49  ;;  %v424_v55 = vrot.slane %v411_v50, %v423_v51  ;;  %v420_v56 = vrot.slane %v411_v50, %v419_v52  ;;  %p3314_p0 = scmp.ne.s32.totalorder %s2881_s23, %s3313_s24  ;;  %p3319_p2 = scmp.lt.s32.totalorder %s3313_s24, %s3313_s24 }
 0x167   :  { %2841 = vmatpush1.bf16.msra.mxu1 %v3214_v58  ;;  %2719 = vmatprep.subr.bf16.mxu0 %v3221_v59  ;;  %v428_v58 = vrot.slane %v411_v50, %v427_v53 }
 0x168   :  { %2842 = vmatprep.subr.bf16.mxu1 %v3223_v60  ;;  %p3320_p3 = por %p3319_p2, %p3318_p1 }
 0x16a   :  { %2720 = vmatpush1.bf16.msra.mxu0 %v3220_v63  ;;  %p3321_p4 = pnand %p3320_p3, %p3314_p0 }
 0x16b   :  { %2843 = vmatpush1.bf16.msra.mxu1 %v3222_v0  ;;  %2721 = vmatprep.subr.bf16.mxu0 %v3229_v1 }
 0x16c   :  { %2844 = vmatprep.subr.bf16.mxu1 %v3231_v2 }
 0x16e   :  { %2722 = vmatpush1.bf16.msra.mxu0 %v3228_v22  ;;  %v443_v22 = vsub.s32 7, %v414_v48 }
 0x16f   :  { %2845 = vmatpush1.bf16.msra.mxu1 %v3230_v6  ;;  %2723 = vmatprep.subr.bf16.mxu0 %v3237_v7  ;;  %v432_v6 = vrot.slane %v411_v50, %v431_v21  ;;  %v440_v7 = vrot.slane %v411_v50, %v439_v4 }
 0x170   :  { %2846 = vmatprep.subr.bf16.mxu1 %v3239_v8  ;;  %v436_v8 = vrot.slane %v411_v50, %v435_v5  ;;  %v444_v9 = vrot.slane %v411_v50, %v443_v22 }
 0x172   :  { %2724 = vmatpush1.bf16.msra.mxu0 %v3236_v13 }
 0x173   :  { %2847 = vmatpush1.bf16.msra.mxu1 %v3238_v14  ;;  %2725 = vmatprep.subr.bf16.mxu0 %v3245_v15 }
 0x174   :  { %2848 = vmatprep.subr.bf16.mxu1 %v3247_v16 }
 0x176   :  { %2726 = vmatpush1.bf16.msra.mxu0 %v3244_v23 }
 0x177   :  { %2849 = vmatpush1.bf16.msra.mxu1 %v3246_v24  ;;  %2727 = vmatprep.subr.bf16.mxu0 %v3253_v25 }
 0x178   :  { %2850 = vmatprep.subr.bf16.mxu1 %v3255_v26 }
 0x17a   :  { %2728 = vmatpush1.bf16.msra.mxu0 %v3252_v31 }
 0x17b   :  { %2851 = vmatpush1.bf16.msra.mxu1 %v3254_v33  ;;  %2729 = vmatprep.subr.bf16.mxu0 %v3261_v34 }
 0x17c   :  { %2852 = vmatprep.subr.bf16.mxu1 %v3263_v35 }
 0x17e   :  { %2730 = vmatpush1.bf16.msra.mxu0 %v3260_v41 }
 0x17f   :  { %2853 = vmatpush1.bf16.msra.mxu1 %v3262_v42  ;;  %2731 = vmatprep.subr.bf16.mxu0 %v3269_v43 }
 0x180   :  { %2854 = vmatprep.subr.bf16.mxu1 %v3271_v44 }
 0x182   :  { %2732 = vmatpush1.bf16.msra.mxu0 %v3268_v45 }
 0x183   :  { %2855 = vmatpush1.bf16.msra.mxu1 %v3270_v46 }
 0x185   :  { %2734 = vmatmul.mubr.bf16.vlgmr.msra.gmra.mrb[4].mxu0 %v3990_v36 }
 0x186   :  { %2857 = vmatmul.mubr.bf16.vlgmr.msra.gmra.mrb[4].mxu1 %v3990_v36 }
 0x198   :  { %v2489_v59 = vpop.f32.mrb[0].mxu0 }
 0x199   :  { %v3272_v60 = vadd.f32 %v2489_v59, %v416_v54  ;;  %v2612_v61 = vpop.f32.mrb[0].mxu1  ;;  %v2491_v57 = vpop.f32.mrb[1].mxu0 }
 0x19a   :  { %v3274_v62 = vadd.f32 %v2612_v61, %v424_v55  ;;  %v3273_v36 = vadd.f32 %v2491_v57, %v420_v56  ;;  %v2614_v12 = vpop.f32.mrb[1].mxu1  ;;  %v2493_v63 = vpop.f32.mrb[2].mxu0 }
 0x19b   :  { %2865 = vst [vmem:[#allocation2] sm:$0xff] %v3272_v60  ;;  %v3275_v0 = vadd.f32 %v2614_v12, %v428_v58  ;;  %v2616_v1 = vpop.f32.mrb[2].mxu1  ;;  %v2494_v2 = vpop.f32.mrb[3].mxu0 }
 0x19c   :  { %2867 = vst [vmem:[#allocation2 + $0x10] sm:$0xff] %v3274_v62  ;;  %2866 = vst [vmem:[#allocation2 + $0x8] sm:$0xff] %v3273_v36  ;;  %v2617_v3 = vpop.f32.mrb[3].mxu1 }
 0x19d   :  { %2868 = vst [vmem:[#allocation2 + $0x18] sm:$0xff] %v3275_v0 }
 0x258   :  { %v2735_v32 = vpop.f32.mrb[4].mxu0 }
 0x259   :  { %v3276_v10 = vadd.f32 %v2735_v32, %v432_v6  ;;  %v2858_v11 = vpop.f32.mrb[4].mxu1  ;;  %v2737_v13 = vpop.f32.mrb[5].mxu0 }
 0x25a   :  { %v3278_v14 = vadd.f32 %v2858_v11, %v440_v7  ;;  %v3277_v15 = vadd.f32 %v2737_v13, %v436_v8  ;;  %v2860_v16 = vpop.f32.mrb[5].mxu1  ;;  %v2739_v17 = vpop.f32.mrb[6].mxu0 }
 0x25b   :  { %2869 = vst [vmem:[#allocation2 + $0x20] sm:$0xff] %v3276_v10  ;;  %v3279_v18 = vadd.f32 %v2860_v16, %v444_v9  ;;  %v2862_v19 = vpop.f32.mrb[6].mxu1  ;;  %v2740_v20 = vpop.f32.mrb[7].mxu0 }
 0x25c   :  { %2871 = vst [vmem:[#allocation2 + $0x30] sm:$0xff] %v3278_v14  ;;  %2870 = vst [vmem:[#allocation2 + $0x28] sm:$0xff] %v3277_v15  ;;  %v2863_v23 = vpop.f32.mrb[7].mxu1 }
 0x25d   :  { %2873 = vst.msk [vmem:[#allocation2 + $0x38] sm:$0xff] %vm2872_vm0, %v3279_v18 }
 0x25e   :  { %3324 = shalt.err (!%p3321_p4)
}
 0x25f   :  { %s3325_s27 = scalar_lea.hbm %s4582_s3, 1024 }
 0x260   :  { %p3326_p5 = scmp.ne.s32.totalorder %s4582_s3, %s3325_s27  ;;  %p3329_p6 = scmp.lt.u32.totalorder %s3325_s27, %s4582_s3 }
 0x262   :  { %p3331_p7 = pnand %p3329_p6, %p3326_p5 }
 0x264   :  { %3334 = shalt.err (!%p3331_p7)
}
 0x265   :  { %2883 = dma.vmem_to_hbm [thread:$0]  %s2881_s23, 1024, %s4582_s3, [#allocation3]  }
 0x266   :  { %3335 = dma.done.wait [#allocation3], 1024  }
 0x267   :  { %3336 = vsyncadd [#allocation3], 4294966272 }
 0x268   :  { %2887 = vsyncpa [#allocation3], 1 }

</bundles_post_ra>
